<compile_context>
chip_gen: v7x
topology: tpu7x:2x2x1
jax: 0.10.0
libtpu: 0.0.40
codegen_flags: <defaults>
</compile_context>

<pallas_src>
import math
from functools import partial

import jax
import jax.numpy as jnp
from jax.experimental import pallas as pl
from jax.experimental.pallas import tpu as pltpu


CFG = dict(vocab_size=64, d_model=32, d_kv=8, num_heads=4, d_ff=64,
           num_layers=2, rel_buckets=32, rel_max_distance=128, n_classes=3,
           cls_hidden=256)


# ---------------------------------------------------------------------------
# Fused encoder + classifier kernel (single pallas_call, everything in VMEM)
# ---------------------------------------------------------------------------

def _fused_encoder_kernel(emb_ref, pos_bias_ref, mask_ref,
                          ln1_ref, wqkv_ref, wo_ref,
                          ln2_ref, wi_ref, woff_ref,
                          fln_ref, pool_ref,
                          w1_ref, b1_ref, w2_ref, b2_ref,
                          logits_ref,
                          *, num_layers, num_heads, d_kv, batch, seq):
    inner = num_heads * d_kv

    def rmsnorm(x, gamma):          # T5 LayerNorm: no mean subtract, no bias
        var = jnp.mean(x * x, axis=-1, keepdims=True)
        return x * jax.lax.rsqrt(var + 1e-6) * gamma

    hidden = emb_ref[...]           # (B*S, D) f32
    mask_add = mask_ref[...]        # (B, S)   f32 additive key mask

    for l in range(num_layers):
        # ---------------- self-attention sublayer (pre-norm) --------------
        normed = rmsnorm(hidden, ln1_ref[l])                       # (B*S, D)
        qkv = jnp.dot(normed.astype(jnp.bfloat16), wqkv_ref[l],
                      preferred_element_type=jnp.float32)          # (B*S, 3*inner)
        q = qkv[:, :inner]
        k = qkv[:, inner:2 * inner]
        v = qkv[:, 2 * inner:]
        wo_l = wo_ref[l]                                           # (inner, D) bf16

        attn_rows = []
        for b in range(batch):
            r0, r1 = b * seq, (b + 1) * seq
            o_b = None
            for h in range(num_heads):
                c0, c1 = h * d_kv, (h + 1) * d_kv
                qh = q[r0:r1, c0:c1]                               # (S, Dk)
                kh = k[r0:r1, c0:c1]
                vh = v[r0:r1, c0:c1]
                # T5 attention: no 1/sqrt(d) scaling; additive rel-pos bias
                # (shared across layers, as in HF T5) + additive key mask
                s = jnp.dot(qh, kh.T, preferred_element_type=jnp.float32)
                s = s + pos_bias_ref[h] + mask_add[b:b + 1, :]
                s = s - jnp.max(s, axis=-1, keepdims=True)
                p = jnp.exp(s)
                p = p * pl.reciprocal(jnp.sum(p, axis=-1, keepdims=True),
                                      approx=True)
                av = jnp.dot(p, vh, preferred_element_type=jnp.float32)   # (S, Dk)
                # fuse the output projection per head: concat_heads @ Wo ==
                # sum_h (P_h @ V_h) @ Wo[h*Dk:(h+1)*Dk, :]
                o_bh = jnp.dot(av.astype(jnp.bfloat16), wo_l[c0:c1, :],
                               preferred_element_type=jnp.float32)        # (S, D)
                o_b = o_bh if o_b is None else o_b + o_bh
            attn_rows.append(o_b)
        attn_out = jnp.concatenate(attn_rows, axis=0)              # (B*S, D)
        hidden = hidden + attn_out                                 # dropout=identity

        # ---------------- feed-forward sublayer (pre-norm, ReLU) ----------
        normed = rmsnorm(hidden, ln2_ref[l])
        hff = jnp.dot(normed.astype(jnp.bfloat16), wi_ref[l],
                      preferred_element_type=jnp.float32)
        hff = jnp.maximum(hff, 0.0)
        hidden = hidden + jnp.dot(hff.astype(jnp.bfloat16), woff_ref[l],
                                  preferred_element_type=jnp.float32)

    hidden = rmsnorm(hidden, fln_ref[...])                         # (B*S, D)

    # mean-pool over seq (matches PyTorch: unmasked mean over dim=1) as a
    # tiny pooling matmul, then Linear -> ReLU -> (Dropout=identity) -> Linear
    pooled = jnp.dot(pool_ref[...], hidden,
                     preferred_element_type=jnp.float32)           # (B, D)
    z = jnp.dot(pooled.astype(jnp.bfloat16), w1_ref[...],
                preferred_element_type=jnp.float32) + b1_ref[...]
    z = jnp.maximum(z, 0.0)
    logits_ref[...] = jnp.dot(z.astype(jnp.bfloat16), w2_ref[...],
                              preferred_element_type=jnp.float32) + b2_ref[...]


def pallas_fused_forward(emb, pos_bias, mask_add, pool_mat, params, cfg):
    """emb: (B*S, D) f32; pos_bias: (H, S, S) f32; mask_add: (B, S) f32;
    pool_mat: (B, B*S) f32.  Returns logits (B, n_classes) f32."""
    B, S = mask_add.shape
    H, Dk, L = cfg["num_heads"], cfg["d_kv"], cfg["num_layers"]

    kernel = partial(_fused_encoder_kernel, num_layers=L, num_heads=H,
                     d_kv=Dk, batch=B, seq=S)
    vmem = pl.BlockSpec(memory_space=pltpu.MemorySpace.VMEM)

    return pl.pallas_call(
        kernel,
        out_shape=jax.ShapeDtypeStruct((B, cfg["n_classes"]), jnp.float32),
        in_specs=[vmem] * 15,
        out_specs=vmem,
        # TODO(synk): for much larger B on v7x, add a batch grid axis marked
        # "parallel" so both TensorCores get work; pointless at B=2.
    )(emb, pos_bias, mask_add,
      params["ln1"], params["wqkv"], params["wo"],
      params["ln2"], params["wi"], params["wo_ff"],
      params["final_ln"], pool_mat,
      params["cls_w1"], params["cls_b1"], params["cls_w2"], params["cls_b2"])


# ---------------------------------------------------------------------------
# T5 relative position bias (integer bucketing = plain-JAX glue)
# ---------------------------------------------------------------------------

def _relative_position_bucket(relative_position, num_buckets=32, max_distance=128):
    # bidirectional (encoder) variant of HF T5 bucketing
    num_buckets //= 2
    relative_buckets = (relative_position > 0).astype(jnp.int32) * num_buckets
    relative_position = jnp.abs(relative_position)
    max_exact = num_buckets // 2
    is_small = relative_position < max_exact
    # clamp log argument to >= 1 so we never take log(0)
    rel_if_large = max_exact + (
        jnp.log(jnp.maximum(relative_position, 1).astype(jnp.float32) / max_exact)
        / math.log(max_distance / max_exact)
        * (num_buckets - max_exact)
    ).astype(jnp.int32)
    rel_if_large = jnp.minimum(rel_if_large, num_buckets - 1)
    relative_buckets += jnp.where(is_small, relative_position, rel_if_large)
    return relative_buckets


def compute_position_bias(rel_bias_table, seq_len, num_buckets, max_distance):
    ctx = jnp.arange(seq_len, dtype=jnp.int32)[:, None]
    mem = jnp.arange(seq_len, dtype=jnp.int32)[None, :]
    buckets = _relative_position_bucket(mem - ctx, num_buckets, max_distance)
    values = rel_bias_table[buckets]                 # (S, S, H)
    return jnp.transpose(values, (2, 0, 1))          # (H, S, S)


# ---------------------------------------------------------------------------
# Model: parameters + forward
# ---------------------------------------------------------------------------

def init_params(key, cfg):
    D, H, Dk, F, L = (cfg["d_model"], cfg["num_heads"], cfg["d_kv"],
                      cfg["d_ff"], cfg["num_layers"])
    inner = H * Dk

    def nrm(k, shape, scale=0.05, dtype=jnp.float32):
        return (scale * jax.random.normal(k, shape, dtype=jnp.float32)).astype(dtype)

    keys = jax.random.split(key, 8)
    # Layer weights are stacked along a leading layer axis; wq/wk/wv are
    # fused into one (D, 3*inner) weight; matmul weights stored in bf16
    # (f32 accumulation inside the kernel).
    params = {
        "embedding": nrm(keys[0], (cfg["vocab_size"], D)),
        "rel_bias":  nrm(keys[1], (cfg["rel_buckets"], H)),
        "ln1":       jnp.ones((L, 1, D), jnp.float32),
        "wqkv":      nrm(keys[2], (L, D, 3 * inner), dtype=jnp.bfloat16),
        "wo":        nrm(keys[3], (L, inner, D), dtype=jnp.bfloat16),
        "ln2":       jnp.ones((L, 1, D), jnp.float32),
        "wi":        nrm(keys[4], (L, D, F), dtype=jnp.bfloat16),
        "wo_ff":     nrm(keys[5], (L, F, D), dtype=jnp.bfloat16),
        "final_ln":  jnp.ones((1, D), jnp.float32),
        "cls_w1":    nrm(keys[6], (D, cfg["cls_hidden"]), dtype=jnp.bfloat16),
        "cls_b1":    jnp.zeros((1, cfg["cls_hidden"]), jnp.float32),
        "cls_w2":    nrm(keys[7], (cfg["cls_hidden"], cfg["n_classes"]),
                         dtype=jnp.bfloat16),
        "cls_b2":    jnp.zeros((1, cfg["n_classes"]), jnp.float32),
    }
    return params


def custom_t5_forward(params, input_ids, attention_mask=None, labels=None,
                      cfg=CFG):
    B, S = input_ids.shape
    D = cfg["d_model"]
    if attention_mask is None:
        attention_mask = jnp.ones((B, S), jnp.float32)

    # embedding gather (plain-JAX glue)
    emb = jnp.take(params["embedding"], input_ids, axis=0).reshape(B * S, D)

    # relative position bias (shared across layers, as in HF T5) + key mask
    pos_bias = compute_position_bias(params["rel_bias"], S,
                                     cfg["rel_buckets"], cfg["rel_max_distance"])
    mask_add = (1.0 - attention_mask.astype(jnp.float32)) * (-1e9)    # (B, S)

    # mean-pool over seq expressed as a (B, B*S) matmul done in-kernel
    pool_mat = jnp.repeat(jnp.eye(B, dtype=jnp.float32), S, axis=1) / float(S)

    logits = pallas_fused_forward(emb, pos_bias, mask_add, pool_mat, params, cfg)

    if labels is not None:
        # nn.CrossEntropyLoss (mean reduction) — tiny, plain-JAX glue
        logp = jax.nn.log_softmax(logits, axis=-1)
        loss = -jnp.mean(jnp.take_along_axis(logp, labels[:, None], axis=-1))
        return loss, logits
    return logits


# ---------------------------------------------------------------------------

if __name__ == "__main__":
    key = jax.random.PRNGKey(0)
    pkey, dkey = jax.random.split(key)

    params = init_params(pkey, CFG)

    B, S = 2, 8
    input_ids = jax.random.randint(dkey, (B, S), 0, CFG["vocab_size"],
                                   dtype=jnp.int32)
    attention_mask = jnp.ones((B, S), jnp.float32)

    fwd = jax.jit(custom_t5_forward)
    logits = fwd(params, input_ids, attention_mask)
    jax.block_until_ready(logits)
    assert logits.shape == (B, CFG["n_classes"]) and logits.dtype == jnp.float32
    assert bool(jnp.all(jnp.isfinite(logits)))

    print("KERNEL_OK")
</pallas_src>

<mosaic_0001>
module attributes {stable_mosaic.version = 11 : i64} {
  func.func @_fused_encoder_kernel(%arg0: memref<16x32xf32, #tpu.memory_space<vmem>>, %arg1: memref<4x8x8xf32, #tpu.memory_space<vmem>>, %arg2: memref<2x8xf32, #tpu.memory_space<vmem>>, %arg3: memref<2x1x32xf32, #tpu.memory_space<vmem>>, %arg4: memref<2x32x96xbf16, #tpu.memory_space<vmem>>, %arg5: memref<2x32x32xbf16, #tpu.memory_space<vmem>>, %arg6: memref<2x1x32xf32, #tpu.memory_space<vmem>>, %arg7: memref<2x32x64xbf16, #tpu.memory_space<vmem>>, %arg8: memref<2x64x32xbf16, #tpu.memory_space<vmem>>, %arg9: memref<1x32xf32, #tpu.memory_space<vmem>>, %arg10: memref<2x16xf32, #tpu.memory_space<vmem>>, %arg11: memref<32x256xbf16, #tpu.memory_space<vmem>>, %arg12: memref<1x256xf32, #tpu.memory_space<vmem>>, %arg13: memref<256x3xbf16, #tpu.memory_space<vmem>>, %arg14: memref<1x3xf32, #tpu.memory_space<vmem>>, %arg15: memref<2x3xf32, #tpu.memory_space<vmem>>) attributes {dimension_semantics = [], scalar_prefetch = 0 : i64, scratch_operands = 0 : i64, tpu.core_type = #tpu.core_type<tc>} {
    %c0 = arith.constant 0 : index
    %c0_0 = arith.constant 0 : index
    %0 = vector.load %arg0[%c0, %c0_0] : memref<16x32xf32, #tpu.memory_space<vmem>>, vector<16x32xf32>
    %c0_1 = arith.constant 0 : index
    %c0_2 = arith.constant 0 : index
    %1 = vector.load %arg2[%c0_1, %c0_2] : memref<2x8xf32, #tpu.memory_space<vmem>>, vector<2x8xf32>
    %c0_3 = arith.constant 0 : index
    %c0_4 = arith.constant 0 : index
    %c0_5 = arith.constant 0 : index
    %2 = vector.load %arg3[%c0_3, %c0_4, %c0_5] : memref<2x1x32xf32, #tpu.memory_space<vmem>>, vector<1x1x32xf32>
    %3 = vector.shape_cast %2 : vector<1x1x32xf32> to vector<1x32xf32>
    %4 = arith.mulf %0, %0 : vector<16x32xf32>
    %cst = arith.constant dense<0.000000e+00> : vector<16xf32>
    %5 = vector.multi_reduction <add>, %4, %cst [1] : vector<16x32xf32> to vector<16xf32>
    %6 = vector.shape_cast %5 : vector<16xf32> to vector<16x1xf32>
    %cst_6 = arith.constant 3.200000e+01 : f32
    %7 = vector.broadcast %cst_6 : f32 to vector<16x1xf32>
    %8 = arith.divf %6, %7 : vector<16x1xf32>
    %cst_7 = arith.constant 9.99999997E-7 : f32
    %9 = vector.broadcast %cst_7 : f32 to vector<16x1xf32>
    %10 = arith.addf %8, %9 : vector<16x1xf32>
    %11 = math.rsqrt %10 : vector<16x1xf32>
    %12 = vector.broadcast %11 : vector<16x1xf32> to vector<16x32xf32>
    %13 = arith.mulf %0, %12 : vector<16x32xf32>
    %14 = vector.broadcast %3 : vector<1x32xf32> to vector<16x32xf32>
    %15 = arith.mulf %13, %14 : vector<16x32xf32>
    %16 = arith.truncf %15 : vector<16x32xf32> to vector<16x32xbf16>
    %c0_8 = arith.constant 0 : index
    %c0_9 = arith.constant 0 : index
    %c0_10 = arith.constant 0 : index
    %17 = vector.load %arg4[%c0_8, %c0_9, %c0_10] : memref<2x32x96xbf16, #tpu.memory_space<vmem>>, vector<1x32x96xbf16>
    %18 = vector.shape_cast %17 : vector<1x32x96xbf16> to vector<32x96xbf16>
    %cst_11 = arith.constant dense<0.000000e+00> : vector<16x96xf32>
    %19 = tpu.matmul %16, %18, %cst_11 {dimension_numbers = #tpu.dot_dimension_numbers<[1], [0], [0], [1], [0, 0, 1, 1], [], []>} : vector<16x32xbf16>, vector<32x96xbf16>, vector<16x96xf32> -> vector<16x96xf32>
    %20 = vector.extract_strided_slice %19 {offsets = [0, 0], sizes = [16, 32], strides = [1, 1]} : vector<16x96xf32> to vector<16x32xf32>
    %21 = vector.extract_strided_slice %19 {offsets = [0, 32], sizes = [16, 32], strides = [1, 1]} : vector<16x96xf32> to vector<16x32xf32>
    %22 = vector.extract_strided_slice %19 {offsets = [0, 64], sizes = [16, 32], strides = [1, 1]} : vector<16x96xf32> to vector<16x32xf32>
    %c0_12 = arith.constant 0 : index
    %c0_13 = arith.constant 0 : index
    %c0_14 = arith.constant 0 : index
    %23 = vector.load %arg5[%c0_12, %c0_13, %c0_14] : memref<2x32x32xbf16, #tpu.memory_space<vmem>>, vector<1x32x32xbf16>
    %24 = vector.shape_cast %23 : vector<1x32x32xbf16> to vector<32x32xbf16>
    %25 = vector.extract_strided_slice %20 {offsets = [0, 0], sizes = [8, 8], strides = [1, 1]} : vector<16x32xf32> to vector<8x8xf32>
    %26 = vector.extract_strided_slice %21 {offsets = [0, 0], sizes = [8, 8], strides = [1, 1]} : vector<16x32xf32> to vector<8x8xf32>
    %27 = vector.extract_strided_slice %22 {offsets = [0, 0], sizes = [8, 8], strides = [1, 1]} : vector<16x32xf32> to vector<8x8xf32>
    %28 = tpu.transpose %26, [1, 0] : vector<8x8xf32> -> vector<8x8xf32>
    %cst_15 = arith.constant dense<0.000000e+00> : vector<8x8xf32>
    %29 = tpu.matmul %25, %28, %cst_15 {dimension_numbers = #tpu.dot_dimension_numbers<[1], [0], [0], [1], [0, 0, 1, 1], [], []>} : vector<8x8xf32>, vector<8x8xf32>, vector<8x8xf32> -> vector<8x8xf32>
    %c0_16 = arith.constant 0 : index
    %c0_17 = arith.constant 0 : index
    %c0_18 = arith.constant 0 : index
    %30 = vector.load %arg1[%c0_16, %c0_17, %c0_18] : memref<4x8x8xf32, #tpu.memory_space<vmem>>, vector<1x8x8xf32>
    %31 = vector.shape_cast %30 : vector<1x8x8xf32> to vector<8x8xf32>
    %32 = arith.addf %29, %31 : vector<8x8xf32>
    %33 = vector.extract_strided_slice %1 {offsets = [0, 0], sizes = [1, 8], strides = [1, 1]} : vector<2x8xf32> to vector<1x8xf32>
    %34 = vector.broadcast %33 : vector<1x8xf32> to vector<8x8xf32>
    %35 = arith.addf %32, %34 : vector<8x8xf32>
    %cst_19 = arith.constant dense<0xFF800000> : vector<8xf32>
    %36 = vector.multi_reduction <maximumf>, %35, %cst_19 [1] : vector<8x8xf32> to vector<8xf32>
    %37 = vector.shape_cast %36 : vector<8xf32> to vector<8x1xf32>
    %38 = vector.broadcast %37 : vector<8x1xf32> to vector<8x8xf32>
    %39 = arith.subf %35, %38 : vector<8x8xf32>
    %40 = math.exp %39 : vector<8x8xf32>
    %cst_20 = arith.constant dense<0.000000e+00> : vector<8xf32>
    %41 = vector.multi_reduction <add>, %40, %cst_20 [1] : vector<8x8xf32> to vector<8xf32>
    %42 = vector.shape_cast %41 : vector<8xf32> to vector<8x1xf32>
    %43 = tpu.reciprocal %42 {approx = true} : vector<8x1xf32> -> vector<8x1xf32>
    %44 = vector.broadcast %43 : vector<8x1xf32> to vector<8x8xf32>
    %45 = arith.mulf %40, %44 : vector<8x8xf32>
    %cst_21 = arith.constant dense<0.000000e+00> : vector<8x8xf32>
    %46 = tpu.matmul %45, %27, %cst_21 {dimension_numbers = #tpu.dot_dimension_numbers<[1], [0], [0], [1], [0, 0, 1, 1], [], []>} : vector<8x8xf32>, vector<8x8xf32>, vector<8x8xf32> -> vector<8x8xf32>
    %47 = arith.truncf %46 : vector<8x8xf32> to vector<8x8xbf16>
    %48 = vector.extract_strided_slice %24 {offsets = [0, 0], sizes = [8, 32], strides = [1, 1]} : vector<32x32xbf16> to vector<8x32xbf16>
    %cst_22 = arith.constant dense<0.000000e+00> : vector<8x32xf32>
    %49 = tpu.matmul %47, %48, %cst_22 {dimension_numbers = #tpu.dot_dimension_numbers<[1], [0], [0], [1], [0, 0, 1, 1], [], []>} : vector<8x8xbf16>, vector<8x32xbf16>, vector<8x32xf32> -> vector<8x32xf32>
    %50 = vector.extract_strided_slice %20 {offsets = [0, 8], sizes = [8, 8], strides = [1, 1]} : vector<16x32xf32> to vector<8x8xf32>
    %51 = vector.extract_strided_slice %21 {offsets = [0, 8], sizes = [8, 8], strides = [1, 1]} : vector<16x32xf32> to vector<8x8xf32>
    %52 = vector.extract_strided_slice %22 {offsets = [0, 8], sizes = [8, 8], strides = [1, 1]} : vector<16x32xf32> to vector<8x8xf32>
    %53 = tpu.transpose %51, [1, 0] : vector<8x8xf32> -> vector<8x8xf32>
    %cst_23 = arith.constant dense<0.000000e+00> : vector<8x8xf32>
    %54 = tpu.matmul %50, %53, %cst_23 {dimension_numbers = #tpu.dot_dimension_numbers<[1], [0], [0], [1], [0, 0, 1, 1], [], []>} : vector<8x8xf32>, vector<8x8xf32>, vector<8x8xf32> -> vector<8x8xf32>
    %c1 = arith.constant 1 : index
    %c0_24 = arith.constant 0 : index
    %c0_25 = arith.constant 0 : index
    %55 = vector.load %arg1[%c1, %c0_24, %c0_25] : memref<4x8x8xf32, #tpu.memory_space<vmem>>, vector<1x8x8xf32>
    %56 = vector.shape_cast %55 : vector<1x8x8xf32> to vector<8x8xf32>
    %57 = arith.addf %54, %56 : vector<8x8xf32>
    %58 = vector.extract_strided_slice %1 {offsets = [0, 0], sizes = [1, 8], strides = [1, 1]} : vector<2x8xf32> to vector<1x8xf32>
    %59 = vector.broadcast %58 : vector<1x8xf32> to vector<8x8xf32>
    %60 = arith.addf %57, %59 : vector<8x8xf32>
    %cst_26 = arith.constant dense<0xFF800000> : vector<8xf32>
    %61 = vector.multi_reduction <maximumf>, %60, %cst_26 [1] : vector<8x8xf32> to vector<8xf32>
    %62 = vector.shape_cast %61 : vector<8xf32> to vector<8x1xf32>
    %63 = vector.broadcast %62 : vector<8x1xf32> to vector<8x8xf32>
    %64 = arith.subf %60, %63 : vector<8x8xf32>
    %65 = math.exp %64 : vector<8x8xf32>
    %cst_27 = arith.constant dense<0.000000e+00> : vector<8xf32>
    %66 = vector.multi_reduction <add>, %65, %cst_27 [1] : vector<8x8xf32> to vector<8xf32>
    %67 = vector.shape_cast %66 : vector<8xf32> to vector<8x1xf32>
    %68 = tpu.reciprocal %67 {approx = true} : vector<8x1xf32> -> vector<8x1xf32>
    %69 = vector.broadcast %68 : vector<8x1xf32> to vector<8x8xf32>
    %70 = arith.mulf %65, %69 : vector<8x8xf32>
    %cst_28 = arith.constant dense<0.000000e+00> : vector<8x8xf32>
    %71 = tpu.matmul %70, %52, %cst_28 {dimension_numbers = #tpu.dot_dimension_numbers<[1], [0], [0], [1], [0, 0, 1, 1], [], []>} : vector<8x8xf32>, vector<8x8xf32>, vector<8x8xf32> -> vector<8x8xf32>
    %72 = arith.truncf %71 : vector<8x8xf32> to vector<8x8xbf16>
    %73 = vector.extract_strided_slice %24 {offsets = [8, 0], sizes = [8, 32], strides = [1, 1]} : vector<32x32xbf16> to vector<8x32xbf16>
    %cst_29 = arith.constant dense<0.000000e+00> : vector<8x32xf32>
    %74 = tpu.matmul %72, %73, %cst_29 {dimension_numbers = #tpu.dot_dimension_numbers<[1], [0], [0], [1], [0, 0, 1, 1], [], []>} : vector<8x8xbf16>, vector<8x32xbf16>, vector<8x32xf32> -> vector<8x32xf32>
    %75 = arith.addf %49, %74 : vector<8x32xf32>
    %76 = vector.extract_strided_slice %20 {offsets = [0, 16], sizes = [8, 8], strides = [1, 1]} : vector<16x32xf32> to vector<8x8xf32>
    %77 = vector.extract_strided_slice %21 {offsets = [0, 16], sizes = [8, 8], strides = [1, 1]} : vector<16x32xf32> to vector<8x8xf32>
    %78 = vector.extract_strided_slice %22 {offsets = [0, 16], sizes = [8, 8], strides = [1, 1]} : vector<16x32xf32> to vector<8x8xf32>
    %79 = tpu.transpose %77, [1, 0] : vector<8x8xf32> -> vector<8x8xf32>
    %cst_30 = arith.constant dense<0.000000e+00> : vector<8x8xf32>
    %80 = tpu.matmul %76, %79, %cst_30 {dimension_numbers = #tpu.dot_dimension_numbers<[1], [0], [0], [1], [0, 0, 1, 1], [], []>} : vector<8x8xf32>, vector<8x8xf32>, vector<8x8xf32> -> vector<8x8xf32>
    %c2 = arith.constant 2 : index
    %c0_31 = arith.constant 0 : index
    %c0_32 = arith.constant 0 : index
    %81 = vector.load %arg1[%c2, %c0_31, %c0_32] : memref<4x8x8xf32, #tpu.memory_space<vmem>>, vector<1x8x8xf32>
    %82 = vector.shape_cast %81 : vector<1x8x8xf32> to vector<8x8xf32>
    %83 = arith.addf %80, %82 : vector<8x8xf32>
    %84 = vector.extract_strided_slice %1 {offsets = [0, 0], sizes = [1, 8], strides = [1, 1]} : vector<2x8xf32> to vector<1x8xf32>
    %85 = vector.broadcast %84 : vector<1x8xf32> to vector<8x8xf32>
    %86 = arith.addf %83, %85 : vector<8x8xf32>
    %cst_33 = arith.constant dense<0xFF800000> : vector<8xf32>
    %87 = vector.multi_reduction <maximumf>, %86, %cst_33 [1] : vector<8x8xf32> to vector<8xf32>
    %88 = vector.shape_cast %87 : vector<8xf32> to vector<8x1xf32>
    %89 = vector.broadcast %88 : vector<8x1xf32> to vector<8x8xf32>
    %90 = arith.subf %86, %89 : vector<8x8xf32>
    %91 = math.exp %90 : vector<8x8xf32>
    %cst_34 = arith.constant dense<0.000000e+00> : vector<8xf32>
    %92 = vector.multi_reduction <add>, %91, %cst_34 [1] : vector<8x8xf32> to vector<8xf32>
    %93 = vector.shape_cast %92 : vector<8xf32> to vector<8x1xf32>
    %94 = tpu.reciprocal %93 {approx = true} : vector<8x1xf32> -> vector<8x1xf32>
    %95 = vector.broadcast %94 : vector<8x1xf32> to vector<8x8xf32>
    %96 = arith.mulf %91, %95 : vector<8x8xf32>
    %cst_35 = arith.constant dense<0.000000e+00> : vector<8x8xf32>
    %97 = tpu.matmul %96, %78, %cst_35 {dimension_numbers = #tpu.dot_dimension_numbers<[1], [0], [0], [1], [0, 0, 1, 1], [], []>} : vector<8x8xf32>, vector<8x8xf32>, vector<8x8xf32> -> vector<8x8xf32>
    %98 = arith.truncf %97 : vector<8x8xf32> to vector<8x8xbf16>
    %99 = vector.extract_strided_slice %24 {offsets = [16, 0], sizes = [8, 32], strides = [1, 1]} : vector<32x32xbf16> to vector<8x32xbf16>
    %cst_36 = arith.constant dense<0.000000e+00> : vector<8x32xf32>
    %100 = tpu.matmul %98, %99, %cst_36 {dimension_numbers = #tpu.dot_dimension_numbers<[1], [0], [0], [1], [0, 0, 1, 1], [], []>} : vector<8x8xbf16>, vector<8x32xbf16>, vector<8x32xf32> -> vector<8x32xf32>
    %101 = arith.addf %75, %100 : vector<8x32xf32>
    %102 = vector.extract_strided_slice %20 {offsets = [0, 24], sizes = [8, 8], strides = [1, 1]} : vector<16x32xf32> to vector<8x8xf32>
    %103 = vector.extract_strided_slice %21 {offsets = [0, 24], sizes = [8, 8], strides = [1, 1]} : vector<16x32xf32> to vector<8x8xf32>
    %104 = vector.extract_strided_slice %22 {offsets = [0, 24], sizes = [8, 8], strides = [1, 1]} : vector<16x32xf32> to vector<8x8xf32>
    %105 = tpu.transpose %103, [1, 0] : vector<8x8xf32> -> vector<8x8xf32>
    %cst_37 = arith.constant dense<0.000000e+00> : vector<8x8xf32>
    %106 = tpu.matmul %102, %105, %cst_37 {dimension_numbers = #tpu.dot_dimension_numbers<[1], [0], [0], [1], [0, 0, 1, 1], [], []>} : vector<8x8xf32>, vector<8x8xf32>, vector<8x8xf32> -> vector<8x8xf32>
    %c3 = arith.constant 3 : index
    %c0_38 = arith.constant 0 : index
    %c0_39 = arith.constant 0 : index
    %107 = vector.load %arg1[%c3, %c0_38, %c0_39] : memref<4x8x8xf32, #tpu.memory_space<vmem>>, vector<1x8x8xf32>
    %108 = vector.shape_cast %107 : vector<1x8x8xf32> to vector<8x8xf32>
    %109 = arith.addf %106, %108 : vector<8x8xf32>
    %110 = vector.extract_strided_slice %1 {offsets = [0, 0], sizes = [1, 8], strides = [1, 1]} : vector<2x8xf32> to vector<1x8xf32>
    %111 = vector.broadcast %110 : vector<1x8xf32> to vector<8x8xf32>
    %112 = arith.addf %109, %111 : vector<8x8xf32>
    %cst_40 = arith.constant dense<0xFF800000> : vector<8xf32>
    %113 = vector.multi_reduction <maximumf>, %112, %cst_40 [1] : vector<8x8xf32> to vector<8xf32>
    %114 = vector.shape_cast %113 : vector<8xf32> to vector<8x1xf32>
    %115 = vector.broadcast %114 : vector<8x1xf32> to vector<8x8xf32>
    %116 = arith.subf %112, %115 : vector<8x8xf32>
    %117 = math.exp %116 : vector<8x8xf32>
    %cst_41 = arith.constant dense<0.000000e+00> : vector<8xf32>
    %118 = vector.multi_reduction <add>, %117, %cst_41 [1] : vector<8x8xf32> to vector<8xf32>
    %119 = vector.shape_cast %118 : vector<8xf32> to vector<8x1xf32>
    %120 = tpu.reciprocal %119 {approx = true} : vector<8x1xf32> -> vector<8x1xf32>
    %121 = vector.broadcast %120 : vector<8x1xf32> to vector<8x8xf32>
    %122 = arith.mulf %117, %121 : vector<8x8xf32>
    %cst_42 = arith.constant dense<0.000000e+00> : vector<8x8xf32>
    %123 = tpu.matmul %122, %104, %cst_42 {dimension_numbers = #tpu.dot_dimension_numbers<[1], [0], [0], [1], [0, 0, 1, 1], [], []>} : vector<8x8xf32>, vector<8x8xf32>, vector<8x8xf32> -> vector<8x8xf32>
    %124 = arith.truncf %123 : vector<8x8xf32> to vector<8x8xbf16>
    %125 = vector.extract_strided_slice %24 {offsets = [24, 0], sizes = [8, 32], strides = [1, 1]} : vector<32x32xbf16> to vector<8x32xbf16>
    %cst_43 = arith.constant dense<0.000000e+00> : vector<8x32xf32>
    %126 = tpu.matmul %124, %125, %cst_43 {dimension_numbers = #tpu.dot_dimension_numbers<[1], [0], [0], [1], [0, 0, 1, 1], [], []>} : vector<8x8xbf16>, vector<8x32xbf16>, vector<8x32xf32> -> vector<8x32xf32>
    %127 = arith.addf %101, %126 : vector<8x32xf32>
    %128 = vector.extract_strided_slice %20 {offsets = [8, 0], sizes = [8, 8], strides = [1, 1]} : vector<16x32xf32> to vector<8x8xf32>
    %129 = vector.extract_strided_slice %21 {offsets = [8, 0], sizes = [8, 8], strides = [1, 1]} : vector<16x32xf32> to vector<8x8xf32>
    %130 = vector.extract_strided_slice %22 {offsets = [8, 0], sizes = [8, 8], strides = [1, 1]} : vector<16x32xf32> to vector<8x8xf32>
    %131 = tpu.transpose %129, [1, 0] : vector<8x8xf32> -> vector<8x8xf32>
    %cst_44 = arith.constant dense<0.000000e+00> : vector<8x8xf32>
    %132 = tpu.matmul %128, %131, %cst_44 {dimension_numbers = #tpu.dot_dimension_numbers<[1], [0], [0], [1], [0, 0, 1, 1], [], []>} : vector<8x8xf32>, vector<8x8xf32>, vector<8x8xf32> -> vector<8x8xf32>
    %c0_45 = arith.constant 0 : index
    %c0_46 = arith.constant 0 : index
    %c0_47 = arith.constant 0 : index
    %133 = vector.load %arg1[%c0_45, %c0_46, %c0_47] : memref<4x8x8xf32, #tpu.memory_space<vmem>>, vector<1x8x8xf32>
    %134 = vector.shape_cast %133 : vector<1x8x8xf32> to vector<8x8xf32>
    %135 = arith.addf %132, %134 : vector<8x8xf32>
    %136 = vector.extract_strided_slice %1 {offsets = [1, 0], sizes = [1, 8], strides = [1, 1]} : vector<2x8xf32> to vector<1x8xf32>
    %137 = vector.broadcast %136 : vector<1x8xf32> to vector<8x8xf32>
    %138 = arith.addf %135, %137 : vector<8x8xf32>
    %cst_48 = arith.constant dense<0xFF800000> : vector<8xf32>
    %139 = vector.multi_reduction <maximumf>, %138, %cst_48 [1] : vector<8x8xf32> to vector<8xf32>
    %140 = vector.shape_cast %139 : vector<8xf32> to vector<8x1xf32>
    %141 = vector.broadcast %140 : vector<8x1xf32> to vector<8x8xf32>
    %142 = arith.subf %138, %141 : vector<8x8xf32>
    %143 = math.exp %142 : vector<8x8xf32>
    %cst_49 = arith.constant dense<0.000000e+00> : vector<8xf32>
    %144 = vector.multi_reduction <add>, %143, %cst_49 [1] : vector<8x8xf32> to vector<8xf32>
    %145 = vector.shape_cast %144 : vector<8xf32> to vector<8x1xf32>
    %146 = tpu.reciprocal %145 {approx = true} : vector<8x1xf32> -> vector<8x1xf32>
    %147 = vector.broadcast %146 : vector<8x1xf32> to vector<8x8xf32>
    %148 = arith.mulf %143, %147 : vector<8x8xf32>
    %cst_50 = arith.constant dense<0.000000e+00> : vector<8x8xf32>
    %149 = tpu.matmul %148, %130, %cst_50 {dimension_numbers = #tpu.dot_dimension_numbers<[1], [0], [0], [1], [0, 0, 1, 1], [], []>} : vector<8x8xf32>, vector<8x8xf32>, vector<8x8xf32> -> vector<8x8xf32>
    %150 = arith.truncf %149 : vector<8x8xf32> to vector<8x8xbf16>
    %151 = vector.extract_strided_slice %24 {offsets = [0, 0], sizes = [8, 32], strides = [1, 1]} : vector<32x32xbf16> to vector<8x32xbf16>
    %cst_51 = arith.constant dense<0.000000e+00> : vector<8x32xf32>
    %152 = tpu.matmul %150, %151, %cst_51 {dimension_numbers = #tpu.dot_dimension_numbers<[1], [0], [0], [1], [0, 0, 1, 1], [], []>} : vector<8x8xbf16>, vector<8x32xbf16>, vector<8x32xf32> -> vector<8x32xf32>
    %153 = vector.extract_strided_slice %20 {offsets = [8, 8], sizes = [8, 8], strides = [1, 1]} : vector<16x32xf32> to vector<8x8xf32>
    %154 = vector.extract_strided_slice %21 {offsets = [8, 8], sizes = [8, 8], strides = [1, 1]} : vector<16x32xf32> to vector<8x8xf32>
    %155 = vector.extract_strided_slice %22 {offsets = [8, 8], sizes = [8, 8], strides = [1, 1]} : vector<16x32xf32> to vector<8x8xf32>
    %156 = tpu.transpose %154, [1, 0] : vector<8x8xf32> -> vector<8x8xf32>
    %cst_52 = arith.constant dense<0.000000e+00> : vector<8x8xf32>
    %157 = tpu.matmul %153, %156, %cst_52 {dimension_numbers = #tpu.dot_dimension_numbers<[1], [0], [0], [1], [0, 0, 1, 1], [], []>} : vector<8x8xf32>, vector<8x8xf32>, vector<8x8xf32> -> vector<8x8xf32>
    %c1_53 = arith.constant 1 : index
    %c0_54 = arith.constant 0 : index
    %c0_55 = arith.constant 0 : index
    %158 = vector.load %arg1[%c1_53, %c0_54, %c0_55] : memref<4x8x8xf32, #tpu.memory_space<vmem>>, vector<1x8x8xf32>
    %159 = vector.shape_cast %158 : vector<1x8x8xf32> to vector<8x8xf32>
    %160 = arith.addf %157, %159 : vector<8x8xf32>
    %161 = vector.extract_strided_slice %1 {offsets = [1, 0], sizes = [1, 8], strides = [1, 1]} : vector<2x8xf32> to vector<1x8xf32>
    %162 = vector.broadcast %161 : vector<1x8xf32> to vector<8x8xf32>
    %163 = arith.addf %160, %162 : vector<8x8xf32>
    %cst_56 = arith.constant dense<0xFF800000> : vector<8xf32>
    %164 = vector.multi_reduction <maximumf>, %163, %cst_56 [1] : vector<8x8xf32> to vector<8xf32>
    %165 = vector.shape_cast %164 : vector<8xf32> to vector<8x1xf32>
    %166 = vector.broadcast %165 : vector<8x1xf32> to vector<8x8xf32>
    %167 = arith.subf %163, %166 : vector<8x8xf32>
    %168 = math.exp %167 : vector<8x8xf32>
    %cst_57 = arith.constant dense<0.000000e+00> : vector<8xf32>
    %169 = vector.multi_reduction <add>, %168, %cst_57 [1] : vector<8x8xf32> to vector<8xf32>
    %170 = vector.shape_cast %169 : vector<8xf32> to vector<8x1xf32>
    %171 = tpu.reciprocal %170 {approx = true} : vector<8x1xf32> -> vector<8x1xf32>
    %172 = vector.broadcast %171 : vector<8x1xf32> to vector<8x8xf32>
    %173 = arith.mulf %168, %172 : vector<8x8xf32>
    %cst_58 = arith.constant dense<0.000000e+00> : vector<8x8xf32>
    %174 = tpu.matmul %173, %155, %cst_58 {dimension_numbers = #tpu.dot_dimension_numbers<[1], [0], [0], [1], [0, 0, 1, 1], [], []>} : vector<8x8xf32>, vector<8x8xf32>, vector<8x8xf32> -> vector<8x8xf32>
    %175 = arith.truncf %174 : vector<8x8xf32> to vector<8x8xbf16>
    %176 = vector.extract_strided_slice %24 {offsets = [8, 0], sizes = [8, 32], strides = [1, 1]} : vector<32x32xbf16> to vector<8x32xbf16>
    %cst_59 = arith.constant dense<0.000000e+00> : vector<8x32xf32>
    %177 = tpu.matmul %175, %176, %cst_59 {dimension_numbers = #tpu.dot_dimension_numbers<[1], [0], [0], [1], [0, 0, 1, 1], [], []>} : vector<8x8xbf16>, vector<8x32xbf16>, vector<8x32xf32> -> vector<8x32xf32>
    %178 = arith.addf %152, %177 : vector<8x32xf32>
    %179 = vector.extract_strided_slice %20 {offsets = [8, 16], sizes = [8, 8], strides = [1, 1]} : vector<16x32xf32> to vector<8x8xf32>
    %180 = vector.extract_strided_slice %21 {offsets = [8, 16], sizes = [8, 8], strides = [1, 1]} : vector<16x32xf32> to vector<8x8xf32>
    %181 = vector.extract_strided_slice %22 {offsets = [8, 16], sizes = [8, 8], strides = [1, 1]} : vector<16x32xf32> to vector<8x8xf32>
    %182 = tpu.transpose %180, [1, 0] : vector<8x8xf32> -> vector<8x8xf32>
    %cst_60 = arith.constant dense<0.000000e+00> : vector<8x8xf32>
    %183 = tpu.matmul %179, %182, %cst_60 {dimension_numbers = #tpu.dot_dimension_numbers<[1], [0], [0], [1], [0, 0, 1, 1], [], []>} : vector<8x8xf32>, vector<8x8xf32>, vector<8x8xf32> -> vector<8x8xf32>
    %c2_61 = arith.constant 2 : index
    %c0_62 = arith.constant 0 : index
    %c0_63 = arith.constant 0 : index
    %184 = vector.load %arg1[%c2_61, %c0_62, %c0_63] : memref<4x8x8xf32, #tpu.memory_space<vmem>>, vector<1x8x8xf32>
    %185 = vector.shape_cast %184 : vector<1x8x8xf32> to vector<8x8xf32>
    %186 = arith.addf %183, %185 : vector<8x8xf32>
    %187 = vector.extract_strided_slice %1 {offsets = [1, 0], sizes = [1, 8], strides = [1, 1]} : vector<2x8xf32> to vector<1x8xf32>
    %188 = vector.broadcast %187 : vector<1x8xf32> to vector<8x8xf32>
    %189 = arith.addf %186, %188 : vector<8x8xf32>
    %cst_64 = arith.constant dense<0xFF800000> : vector<8xf32>
    %190 = vector.multi_reduction <maximumf>, %189, %cst_64 [1] : vector<8x8xf32> to vector<8xf32>
    %191 = vector.shape_cast %190 : vector<8xf32> to vector<8x1xf32>
    %192 = vector.broadcast %191 : vector<8x1xf32> to vector<8x8xf32>
    %193 = arith.subf %189, %192 : vector<8x8xf32>
    %194 = math.exp %193 : vector<8x8xf32>
    %cst_65 = arith.constant dense<0.000000e+00> : vector<8xf32>
    %195 = vector.multi_reduction <add>, %194, %cst_65 [1] : vector<8x8xf32> to vector<8xf32>
    %196 = vector.shape_cast %195 : vector<8xf32> to vector<8x1xf32>
    %197 = tpu.reciprocal %196 {approx = true} : vector<8x1xf32> -> vector<8x1xf32>
    %198 = vector.broadcast %197 : vector<8x1xf32> to vector<8x8xf32>
    %199 = arith.mulf %194, %198 : vector<8x8xf32>
    %cst_66 = arith.constant dense<0.000000e+00> : vector<8x8xf32>
    %200 = tpu.matmul %199, %181, %cst_66 {dimension_numbers = #tpu.dot_dimension_numbers<[1], [0], [0], [1], [0, 0, 1, 1], [], []>} : vector<8x8xf32>, vector<8x8xf32>, vector<8x8xf32> -> vector<8x8xf32>
    %201 = arith.truncf %200 : vector<8x8xf32> to vector<8x8xbf16>
    %202 = vector.extract_strided_slice %24 {offsets = [16, 0], sizes = [8, 32], strides = [1, 1]} : vector<32x32xbf16> to vector<8x32xbf16>
    %cst_67 = arith.constant dense<0.000000e+00> : vector<8x32xf32>
    %203 = tpu.matmul %201, %202, %cst_67 {dimension_numbers = #tpu.dot_dimension_numbers<[1], [0], [0], [1], [0, 0, 1, 1], [], []>} : vector<8x8xbf16>, vector<8x32xbf16>, vector<8x32xf32> -> vector<8x32xf32>
    %204 = arith.addf %178, %203 : vector<8x32xf32>
    %205 = vector.extract_strided_slice %20 {offsets = [8, 24], sizes = [8, 8], strides = [1, 1]} : vector<16x32xf32> to vector<8x8xf32>
    %206 = vector.extract_strided_slice %21 {offsets = [8, 24], sizes = [8, 8], strides = [1, 1]} : vector<16x32xf32> to vector<8x8xf32>
    %207 = vector.extract_strided_slice %22 {offsets = [8, 24], sizes = [8, 8], strides = [1, 1]} : vector<16x32xf32> to vector<8x8xf32>
    %208 = tpu.transpose %206, [1, 0] : vector<8x8xf32> -> vector<8x8xf32>
    %cst_68 = arith.constant dense<0.000000e+00> : vector<8x8xf32>
    %209 = tpu.matmul %205, %208, %cst_68 {dimension_numbers = #tpu.dot_dimension_numbers<[1], [0], [0], [1], [0, 0, 1, 1], [], []>} : vector<8x8xf32>, vector<8x8xf32>, vector<8x8xf32> -> vector<8x8xf32>
    %c3_69 = arith.constant 3 : index
    %c0_70 = arith.constant 0 : index
    %c0_71 = arith.constant 0 : index
    %210 = vector.load %arg1[%c3_69, %c0_70, %c0_71] : memref<4x8x8xf32, #tpu.memory_space<vmem>>, vector<1x8x8xf32>
    %211 = vector.shape_cast %210 : vector<1x8x8xf32> to vector<8x8xf32>
    %212 = arith.addf %209, %211 : vector<8x8xf32>
    %213 = vector.extract_strided_slice %1 {offsets = [1, 0], sizes = [1, 8], strides = [1, 1]} : vector<2x8xf32> to vector<1x8xf32>
    %214 = vector.broadcast %213 : vector<1x8xf32> to vector<8x8xf32>
    %215 = arith.addf %212, %214 : vector<8x8xf32>
    %cst_72 = arith.constant dense<0xFF800000> : vector<8xf32>
    %216 = vector.multi_reduction <maximumf>, %215, %cst_72 [1] : vector<8x8xf32> to vector<8xf32>
    %217 = vector.shape_cast %216 : vector<8xf32> to vector<8x1xf32>
    %218 = vector.broadcast %217 : vector<8x1xf32> to vector<8x8xf32>
    %219 = arith.subf %215, %218 : vector<8x8xf32>
    %220 = math.exp %219 : vector<8x8xf32>
    %cst_73 = arith.constant dense<0.000000e+00> : vector<8xf32>
    %221 = vector.multi_reduction <add>, %220, %cst_73 [1] : vector<8x8xf32> to vector<8xf32>
    %222 = vector.shape_cast %221 : vector<8xf32> to vector<8x1xf32>
    %223 = tpu.reciprocal %222 {approx = true} : vector<8x1xf32> -> vector<8x1xf32>
    %224 = vector.broadcast %223 : vector<8x1xf32> to vector<8x8xf32>
    %225 = arith.mulf %220, %224 : vector<8x8xf32>
    %cst_74 = arith.constant dense<0.000000e+00> : vector<8x8xf32>
    %226 = tpu.matmul %225, %207, %cst_74 {dimension_numbers = #tpu.dot_dimension_numbers<[1], [0], [0], [1], [0, 0, 1, 1], [], []>} : vector<8x8xf32>, vector<8x8xf32>, vector<8x8xf32> -> vector<8x8xf32>
    %227 = arith.truncf %226 : vector<8x8xf32> to vector<8x8xbf16>
    %228 = vector.extract_strided_slice %24 {offsets = [24, 0], sizes = [8, 32], strides = [1, 1]} : vector<32x32xbf16> to vector<8x32xbf16>
    %cst_75 = arith.constant dense<0.000000e+00> : vector<8x32xf32>
    %229 = tpu.matmul %227, %228, %cst_75 {dimension_numbers = #tpu.dot_dimension_numbers<[1], [0], [0], [1], [0, 0, 1, 1], [], []>} : vector<8x8xbf16>, vector<8x32xbf16>, vector<8x32xf32> -> vector<8x32xf32>
    %230 = arith.addf %204, %229 : vector<8x32xf32>
    %231 = tpu.concatenate %127, %230 in 0 : vector<8x32xf32>, vector<8x32xf32> -> vector<16x32xf32>
    %232 = arith.addf %0, %231 : vector<16x32xf32>
    %c0_76 = arith.constant 0 : index
    %c0_77 = arith.constant 0 : index
    %c0_78 = arith.constant 0 : index
    %233 = vector.load %arg6[%c0_76, %c0_77, %c0_78] : memref<2x1x32xf32, #tpu.memory_space<vmem>>, vector<1x1x32xf32>
    %234 = vector.shape_cast %233 : vector<1x1x32xf32> to vector<1x32xf32>
    %235 = arith.mulf %232, %232 : vector<16x32xf32>
    %cst_79 = arith.constant dense<0.000000e+00> : vector<16xf32>
    %236 = vector.multi_reduction <add>, %235, %cst_79 [1] : vector<16x32xf32> to vector<16xf32>
    %237 = vector.shape_cast %236 : vector<16xf32> to vector<16x1xf32>
    %cst_80 = arith.constant 3.200000e+01 : f32
    %238 = vector.broadcast %cst_80 : f32 to vector<16x1xf32>
    %239 = arith.divf %237, %238 : vector<16x1xf32>
    %cst_81 = arith.constant 9.99999997E-7 : f32
    %240 = vector.broadcast %cst_81 : f32 to vector<16x1xf32>
    %241 = arith.addf %239, %240 : vector<16x1xf32>
    %242 = math.rsqrt %241 : vector<16x1xf32>
    %243 = vector.broadcast %242 : vector<16x1xf32> to vector<16x32xf32>
    %244 = arith.mulf %232, %243 : vector<16x32xf32>
    %245 = vector.broadcast %234 : vector<1x32xf32> to vector<16x32xf32>
    %246 = arith.mulf %244, %245 : vector<16x32xf32>
    %247 = arith.truncf %246 : vector<16x32xf32> to vector<16x32xbf16>
    %c0_82 = arith.constant 0 : index
    %c0_83 = arith.constant 0 : index
    %c0_84 = arith.constant 0 : index
    %248 = vector.load %arg7[%c0_82, %c0_83, %c0_84] : memref<2x32x64xbf16, #tpu.memory_space<vmem>>, vector<1x32x64xbf16>
    %249 = vector.shape_cast %248 : vector<1x32x64xbf16> to vector<32x64xbf16>
    %cst_85 = arith.constant dense<0.000000e+00> : vector<16x64xf32>
    %250 = tpu.matmul %247, %249, %cst_85 {dimension_numbers = #tpu.dot_dimension_numbers<[1], [0], [0], [1], [0, 0, 1, 1], [], []>} : vector<16x32xbf16>, vector<32x64xbf16>, vector<16x64xf32> -> vector<16x64xf32>
    %cst_86 = arith.constant 0.000000e+00 : f32
    %251 = vector.broadcast %cst_86 : f32 to vector<16x64xf32>
    %252 = arith.maximumf %250, %251 : vector<16x64xf32>
    %253 = arith.truncf %252 : vector<16x64xf32> to vector<16x64xbf16>
    %c0_87 = arith.constant 0 : index
    %c0_88 = arith.constant 0 : index
    %c0_89 = arith.constant 0 : index
    %254 = vector.load %arg8[%c0_87, %c0_88, %c0_89] : memref<2x64x32xbf16, #tpu.memory_space<vmem>>, vector<1x64x32xbf16>
    %255 = vector.shape_cast %254 : vector<1x64x32xbf16> to vector<64x32xbf16>
    %cst_90 = arith.constant dense<0.000000e+00> : vector<16x32xf32>
    %256 = tpu.matmul %253, %255, %cst_90 {dimension_numbers = #tpu.dot_dimension_numbers<[1], [0], [0], [1], [0, 0, 1, 1], [], []>} : vector<16x64xbf16>, vector<64x32xbf16>, vector<16x32xf32> -> vector<16x32xf32>
    %257 = arith.addf %232, %256 : vector<16x32xf32>
    %c1_91 = arith.constant 1 : index
    %c0_92 = arith.constant 0 : index
    %c0_93 = arith.constant 0 : index
    %258 = vector.load %arg3[%c1_91, %c0_92, %c0_93] : memref<2x1x32xf32, #tpu.memory_space<vmem>>, vector<1x1x32xf32>
    %259 = vector.shape_cast %258 : vector<1x1x32xf32> to vector<1x32xf32>
    %260 = arith.mulf %257, %257 : vector<16x32xf32>
    %cst_94 = arith.constant dense<0.000000e+00> : vector<16xf32>
    %261 = vector.multi_reduction <add>, %260, %cst_94 [1] : vector<16x32xf32> to vector<16xf32>
    %262 = vector.shape_cast %261 : vector<16xf32> to vector<16x1xf32>
    %cst_95 = arith.constant 3.200000e+01 : f32
    %263 = vector.broadcast %cst_95 : f32 to vector<16x1xf32>
    %264 = arith.divf %262, %263 : vector<16x1xf32>
    %cst_96 = arith.constant 9.99999997E-7 : f32
    %265 = vector.broadcast %cst_96 : f32 to vector<16x1xf32>
    %266 = arith.addf %264, %265 : vector<16x1xf32>
    %267 = math.rsqrt %266 : vector<16x1xf32>
    %268 = vector.broadcast %267 : vector<16x1xf32> to vector<16x32xf32>
    %269 = arith.mulf %257, %268 : vector<16x32xf32>
    %270 = vector.broadcast %259 : vector<1x32xf32> to vector<16x32xf32>
    %271 = arith.mulf %269, %270 : vector<16x32xf32>
    %272 = arith.truncf %271 : vector<16x32xf32> to vector<16x32xbf16>
    %c1_97 = arith.constant 1 : index
    %c0_98 = arith.constant 0 : index
    %c0_99 = arith.constant 0 : index
    %273 = vector.load %arg4[%c1_97, %c0_98, %c0_99] : memref<2x32x96xbf16, #tpu.memory_space<vmem>>, vector<1x32x96xbf16>
    %274 = vector.shape_cast %273 : vector<1x32x96xbf16> to vector<32x96xbf16>
    %cst_100 = arith.constant dense<0.000000e+00> : vector<16x96xf32>
    %275 = tpu.matmul %272, %274, %cst_100 {dimension_numbers = #tpu.dot_dimension_numbers<[1], [0], [0], [1], [0, 0, 1, 1], [], []>} : vector<16x32xbf16>, vector<32x96xbf16>, vector<16x96xf32> -> vector<16x96xf32>
    %276 = vector.extract_strided_slice %275 {offsets = [0, 0], sizes = [16, 32], strides = [1, 1]} : vector<16x96xf32> to vector<16x32xf32>
    %277 = vector.extract_strided_slice %275 {offsets = [0, 32], sizes = [16, 32], strides = [1, 1]} : vector<16x96xf32> to vector<16x32xf32>
    %278 = vector.extract_strided_slice %275 {offsets = [0, 64], sizes = [16, 32], strides = [1, 1]} : vector<16x96xf32> to vector<16x32xf32>
    %c1_101 = arith.constant 1 : index
    %c0_102 = arith.constant 0 : index
    %c0_103 = arith.constant 0 : index
    %279 = vector.load %arg5[%c1_101, %c0_102, %c0_103] : memref<2x32x32xbf16, #tpu.memory_space<vmem>>, vector<1x32x32xbf16>
    %280 = vector.shape_cast %279 : vector<1x32x32xbf16> to vector<32x32xbf16>
    %281 = vector.extract_strided_slice %276 {offsets = [0, 0], sizes = [8, 8], strides = [1, 1]} : vector<16x32xf32> to vector<8x8xf32>
    %282 = vector.extract_strided_slice %277 {offsets = [0, 0], sizes = [8, 8], strides = [1, 1]} : vector<16x32xf32> to vector<8x8xf32>
    %283 = vector.extract_strided_slice %278 {offsets = [0, 0], sizes = [8, 8], strides = [1, 1]} : vector<16x32xf32> to vector<8x8xf32>
    %284 = tpu.transpose %282, [1, 0] : vector<8x8xf32> -> vector<8x8xf32>
    %cst_104 = arith.constant dense<0.000000e+00> : vector<8x8xf32>
    %285 = tpu.matmul %281, %284, %cst_104 {dimension_numbers = #tpu.dot_dimension_numbers<[1], [0], [0], [1], [0, 0, 1, 1], [], []>} : vector<8x8xf32>, vector<8x8xf32>, vector<8x8xf32> -> vector<8x8xf32>
    %c0_105 = arith.constant 0 : index
    %c0_106 = arith.constant 0 : index
    %c0_107 = arith.constant 0 : index
    %286 = vector.load %arg1[%c0_105, %c0_106, %c0_107] : memref<4x8x8xf32, #tpu.memory_space<vmem>>, vector<1x8x8xf32>
    %287 = vector.shape_cast %286 : vector<1x8x8xf32> to vector<8x8xf32>
    %288 = arith.addf %285, %287 : vector<8x8xf32>
    %289 = vector.extract_strided_slice %1 {offsets = [0, 0], sizes = [1, 8], strides = [1, 1]} : vector<2x8xf32> to vector<1x8xf32>
    %290 = vector.broadcast %289 : vector<1x8xf32> to vector<8x8xf32>
    %291 = arith.addf %288, %290 : vector<8x8xf32>
    %cst_108 = arith.constant dense<0xFF800000> : vector<8xf32>
    %292 = vector.multi_reduction <maximumf>, %291, %cst_108 [1] : vector<8x8xf32> to vector<8xf32>
    %293 = vector.shape_cast %292 : vector<8xf32> to vector<8x1xf32>
    %294 = vector.broadcast %293 : vector<8x1xf32> to vector<8x8xf32>
    %295 = arith.subf %291, %294 : vector<8x8xf32>
    %296 = math.exp %295 : vector<8x8xf32>
    %cst_109 = arith.constant dense<0.000000e+00> : vector<8xf32>
    %297 = vector.multi_reduction <add>, %296, %cst_109 [1] : vector<8x8xf32> to vector<8xf32>
    %298 = vector.shape_cast %297 : vector<8xf32> to vector<8x1xf32>
    %299 = tpu.reciprocal %298 {approx = true} : vector<8x1xf32> -> vector<8x1xf32>
    %300 = vector.broadcast %299 : vector<8x1xf32> to vector<8x8xf32>
    %301 = arith.mulf %296, %300 : vector<8x8xf32>
    %cst_110 = arith.constant dense<0.000000e+00> : vector<8x8xf32>
    %302 = tpu.matmul %301, %283, %cst_110 {dimension_numbers = #tpu.dot_dimension_numbers<[1], [0], [0], [1], [0, 0, 1, 1], [], []>} : vector<8x8xf32>, vector<8x8xf32>, vector<8x8xf32> -> vector<8x8xf32>
    %303 = arith.truncf %302 : vector<8x8xf32> to vector<8x8xbf16>
    %304 = vector.extract_strided_slice %280 {offsets = [0, 0], sizes = [8, 32], strides = [1, 1]} : vector<32x32xbf16> to vector<8x32xbf16>
    %cst_111 = arith.constant dense<0.000000e+00> : vector<8x32xf32>
    %305 = tpu.matmul %303, %304, %cst_111 {dimension_numbers = #tpu.dot_dimension_numbers<[1], [0], [0], [1], [0, 0, 1, 1], [], []>} : vector<8x8xbf16>, vector<8x32xbf16>, vector<8x32xf32> -> vector<8x32xf32>
    %306 = vector.extract_strided_slice %276 {offsets = [0, 8], sizes = [8, 8], strides = [1, 1]} : vector<16x32xf32> to vector<8x8xf32>
    %307 = vector.extract_strided_slice %277 {offsets = [0, 8], sizes = [8, 8], strides = [1, 1]} : vector<16x32xf32> to vector<8x8xf32>
    %308 = vector.extract_strided_slice %278 {offsets = [0, 8], sizes = [8, 8], strides = [1, 1]} : vector<16x32xf32> to vector<8x8xf32>
    %309 = tpu.transpose %307, [1, 0] : vector<8x8xf32> -> vector<8x8xf32>
    %cst_112 = arith.constant dense<0.000000e+00> : vector<8x8xf32>
    %310 = tpu.matmul %306, %309, %cst_112 {dimension_numbers = #tpu.dot_dimension_numbers<[1], [0], [0], [1], [0, 0, 1, 1], [], []>} : vector<8x8xf32>, vector<8x8xf32>, vector<8x8xf32> -> vector<8x8xf32>
    %c1_113 = arith.constant 1 : index
    %c0_114 = arith.constant 0 : index
    %c0_115 = arith.constant 0 : index
    %311 = vector.load %arg1[%c1_113, %c0_114, %c0_115] : memref<4x8x8xf32, #tpu.memory_space<vmem>>, vector<1x8x8xf32>
    %312 = vector.shape_cast %311 : vector<1x8x8xf32> to vector<8x8xf32>
    %313 = arith.addf %310, %312 : vector<8x8xf32>
    %314 = vector.extract_strided_slice %1 {offsets = [0, 0], sizes = [1, 8], strides = [1, 1]} : vector<2x8xf32> to vector<1x8xf32>
    %315 = vector.broadcast %314 : vector<1x8xf32> to vector<8x8xf32>
    %316 = arith.addf %313, %315 : vector<8x8xf32>
    %cst_116 = arith.constant dense<0xFF800000> : vector<8xf32>
    %317 = vector.multi_reduction <maximumf>, %316, %cst_116 [1] : vector<8x8xf32> to vector<8xf32>
    %318 = vector.shape_cast %317 : vector<8xf32> to vector<8x1xf32>
    %319 = vector.broadcast %318 : vector<8x1xf32> to vector<8x8xf32>
    %320 = arith.subf %316, %319 : vector<8x8xf32>
    %321 = math.exp %320 : vector<8x8xf32>
    %cst_117 = arith.constant dense<0.000000e+00> : vector<8xf32>
    %322 = vector.multi_reduction <add>, %321, %cst_117 [1] : vector<8x8xf32> to vector<8xf32>
    %323 = vector.shape_cast %322 : vector<8xf32> to vector<8x1xf32>
    %324 = tpu.reciprocal %323 {approx = true} : vector<8x1xf32> -> vector<8x1xf32>
    %325 = vector.broadcast %324 : vector<8x1xf32> to vector<8x8xf32>
    %326 = arith.mulf %321, %325 : vector<8x8xf32>
    %cst_118 = arith.constant dense<0.000000e+00> : vector<8x8xf32>
    %327 = tpu.matmul %326, %308, %cst_118 {dimension_numbers = #tpu.dot_dimension_numbers<[1], [0], [0], [1], [0, 0, 1, 1], [], []>} : vector<8x8xf32>, vector<8x8xf32>, vector<8x8xf32> -> vector<8x8xf32>
    %328 = arith.truncf %327 : vector<8x8xf32> to vector<8x8xbf16>
    %329 = vector.extract_strided_slice %280 {offsets = [8, 0], sizes = [8, 32], strides = [1, 1]} : vector<32x32xbf16> to vector<8x32xbf16>
    %cst_119 = arith.constant dense<0.000000e+00> : vector<8x32xf32>
    %330 = tpu.matmul %328, %329, %cst_119 {dimension_numbers = #tpu.dot_dimension_numbers<[1], [0], [0], [1], [0, 0, 1, 1], [], []>} : vector<8x8xbf16>, vector<8x32xbf16>, vector<8x32xf32> -> vector<8x32xf32>
    %331 = arith.addf %305, %330 : vector<8x32xf32>
    %332 = vector.extract_strided_slice %276 {offsets = [0, 16], sizes = [8, 8], strides = [1, 1]} : vector<16x32xf32> to vector<8x8xf32>
    %333 = vector.extract_strided_slice %277 {offsets = [0, 16], sizes = [8, 8], strides = [1, 1]} : vector<16x32xf32> to vector<8x8xf32>
    %334 = vector.extract_strided_slice %278 {offsets = [0, 16], sizes = [8, 8], strides = [1, 1]} : vector<16x32xf32> to vector<8x8xf32>
    %335 = tpu.transpose %333, [1, 0] : vector<8x8xf32> -> vector<8x8xf32>
    %cst_120 = arith.constant dense<0.000000e+00> : vector<8x8xf32>
    %336 = tpu.matmul %332, %335, %cst_120 {dimension_numbers = #tpu.dot_dimension_numbers<[1], [0], [0], [1], [0, 0, 1, 1], [], []>} : vector<8x8xf32>, vector<8x8xf32>, vector<8x8xf32> -> vector<8x8xf32>
    %c2_121 = arith.constant 2 : index
    %c0_122 = arith.constant 0 : index
    %c0_123 = arith.constant 0 : index
    %337 = vector.load %arg1[%c2_121, %c0_122, %c0_123] : memref<4x8x8xf32, #tpu.memory_space<vmem>>, vector<1x8x8xf32>
    %338 = vector.shape_cast %337 : vector<1x8x8xf32> to vector<8x8xf32>
    %339 = arith.addf %336, %338 : vector<8x8xf32>
    %340 = vector.extract_strided_slice %1 {offsets = [0, 0], sizes = [1, 8], strides = [1, 1]} : vector<2x8xf32> to vector<1x8xf32>
    %341 = vector.broadcast %340 : vector<1x8xf32> to vector<8x8xf32>
    %342 = arith.addf %339, %341 : vector<8x8xf32>
    %cst_124 = arith.constant dense<0xFF800000> : vector<8xf32>
    %343 = vector.multi_reduction <maximumf>, %342, %cst_124 [1] : vector<8x8xf32> to vector<8xf32>
    %344 = vector.shape_cast %343 : vector<8xf32> to vector<8x1xf32>
    %345 = vector.broadcast %344 : vector<8x1xf32> to vector<8x8xf32>
    %346 = arith.subf %342, %345 : vector<8x8xf32>
    %347 = math.exp %346 : vector<8x8xf32>
    %cst_125 = arith.constant dense<0.000000e+00> : vector<8xf32>
    %348 = vector.multi_reduction <add>, %347, %cst_125 [1] : vector<8x8xf32> to vector<8xf32>
    %349 = vector.shape_cast %348 : vector<8xf32> to vector<8x1xf32>
    %350 = tpu.reciprocal %349 {approx = true} : vector<8x1xf32> -> vector<8x1xf32>
    %351 = vector.broadcast %350 : vector<8x1xf32> to vector<8x8xf32>
    %352 = arith.mulf %347, %351 : vector<8x8xf32>
    %cst_126 = arith.constant dense<0.000000e+00> : vector<8x8xf32>
    %353 = tpu.matmul %352, %334, %cst_126 {dimension_numbers = #tpu.dot_dimension_numbers<[1], [0], [0], [1], [0, 0, 1, 1], [], []>} : vector<8x8xf32>, vector<8x8xf32>, vector<8x8xf32> -> vector<8x8xf32>
    %354 = arith.truncf %353 : vector<8x8xf32> to vector<8x8xbf16>
    %355 = vector.extract_strided_slice %280 {offsets = [16, 0], sizes = [8, 32], strides = [1, 1]} : vector<32x32xbf16> to vector<8x32xbf16>
    %cst_127 = arith.constant dense<0.000000e+00> : vector<8x32xf32>
    %356 = tpu.matmul %354, %355, %cst_127 {dimension_numbers = #tpu.dot_dimension_numbers<[1], [0], [0], [1], [0, 0, 1, 1], [], []>} : vector<8x8xbf16>, vector<8x32xbf16>, vector<8x32xf32> -> vector<8x32xf32>
    %357 = arith.addf %331, %356 : vector<8x32xf32>
    %358 = vector.extract_strided_slice %276 {offsets = [0, 24], sizes = [8, 8], strides = [1, 1]} : vector<16x32xf32> to vector<8x8xf32>
    %359 = vector.extract_strided_slice %277 {offsets = [0, 24], sizes = [8, 8], strides = [1, 1]} : vector<16x32xf32> to vector<8x8xf32>
    %360 = vector.extract_strided_slice %278 {offsets = [0, 24], sizes = [8, 8], strides = [1, 1]} : vector<16x32xf32> to vector<8x8xf32>
    %361 = tpu.transpose %359, [1, 0] : vector<8x8xf32> -> vector<8x8xf32>
    %cst_128 = arith.constant dense<0.000000e+00> : vector<8x8xf32>
    %362 = tpu.matmul %358, %361, %cst_128 {dimension_numbers = #tpu.dot_dimension_numbers<[1], [0], [0], [1], [0, 0, 1, 1], [], []>} : vector<8x8xf32>, vector<8x8xf32>, vector<8x8xf32> -> vector<8x8xf32>
    %c3_129 = arith.constant 3 : index
    %c0_130 = arith.constant 0 : index
    %c0_131 = arith.constant 0 : index
    %363 = vector.load %arg1[%c3_129, %c0_130, %c0_131] : memref<4x8x8xf32, #tpu.memory_space<vmem>>, vector<1x8x8xf32>
    %364 = vector.shape_cast %363 : vector<1x8x8xf32> to vector<8x8xf32>
    %365 = arith.addf %362, %364 : vector<8x8xf32>
    %366 = vector.extract_strided_slice %1 {offsets = [0, 0], sizes = [1, 8], strides = [1, 1]} : vector<2x8xf32> to vector<1x8xf32>
    %367 = vector.broadcast %366 : vector<1x8xf32> to vector<8x8xf32>
    %368 = arith.addf %365, %367 : vector<8x8xf32>
    %cst_132 = arith.constant dense<0xFF800000> : vector<8xf32>
    %369 = vector.multi_reduction <maximumf>, %368, %cst_132 [1] : vector<8x8xf32> to vector<8xf32>
    %370 = vector.shape_cast %369 : vector<8xf32> to vector<8x1xf32>
    %371 = vector.broadcast %370 : vector<8x1xf32> to vector<8x8xf32>
    %372 = arith.subf %368, %371 : vector<8x8xf32>
    %373 = math.exp %372 : vector<8x8xf32>
    %cst_133 = arith.constant dense<0.000000e+00> : vector<8xf32>
    %374 = vector.multi_reduction <add>, %373, %cst_133 [1] : vector<8x8xf32> to vector<8xf32>
    %375 = vector.shape_cast %374 : vector<8xf32> to vector<8x1xf32>
    %376 = tpu.reciprocal %375 {approx = true} : vector<8x1xf32> -> vector<8x1xf32>
    %377 = vector.broadcast %376 : vector<8x1xf32> to vector<8x8xf32>
    %378 = arith.mulf %373, %377 : vector<8x8xf32>
    %cst_134 = arith.constant dense<0.000000e+00> : vector<8x8xf32>
    %379 = tpu.matmul %378, %360, %cst_134 {dimension_numbers = #tpu.dot_dimension_numbers<[1], [0], [0], [1], [0, 0, 1, 1], [], []>} : vector<8x8xf32>, vector<8x8xf32>, vector<8x8xf32> -> vector<8x8xf32>
    %380 = arith.truncf %379 : vector<8x8xf32> to vector<8x8xbf16>
    %381 = vector.extract_strided_slice %280 {offsets = [24, 0], sizes = [8, 32], strides = [1, 1]} : vector<32x32xbf16> to vector<8x32xbf16>
    %cst_135 = arith.constant dense<0.000000e+00> : vector<8x32xf32>
    %382 = tpu.matmul %380, %381, %cst_135 {dimension_numbers = #tpu.dot_dimension_numbers<[1], [0], [0], [1], [0, 0, 1, 1], [], []>} : vector<8x8xbf16>, vector<8x32xbf16>, vector<8x32xf32> -> vector<8x32xf32>
    %383 = arith.addf %357, %382 : vector<8x32xf32>
    %384 = vector.extract_strided_slice %276 {offsets = [8, 0], sizes = [8, 8], strides = [1, 1]} : vector<16x32xf32> to vector<8x8xf32>
    %385 = vector.extract_strided_slice %277 {offsets = [8, 0], sizes = [8, 8], strides = [1, 1]} : vector<16x32xf32> to vector<8x8xf32>
    %386 = vector.extract_strided_slice %278 {offsets = [8, 0], sizes = [8, 8], strides = [1, 1]} : vector<16x32xf32> to vector<8x8xf32>
    %387 = tpu.transpose %385, [1, 0] : vector<8x8xf32> -> vector<8x8xf32>
    %cst_136 = arith.constant dense<0.000000e+00> : vector<8x8xf32>
    %388 = tpu.matmul %384, %387, %cst_136 {dimension_numbers = #tpu.dot_dimension_numbers<[1], [0], [0], [1], [0, 0, 1, 1], [], []>} : vector<8x8xf32>, vector<8x8xf32>, vector<8x8xf32> -> vector<8x8xf32>
    %c0_137 = arith.constant 0 : index
    %c0_138 = arith.constant 0 : index
    %c0_139 = arith.constant 0 : index
    %389 = vector.load %arg1[%c0_137, %c0_138, %c0_139] : memref<4x8x8xf32, #tpu.memory_space<vmem>>, vector<1x8x8xf32>
    %390 = vector.shape_cast %389 : vector<1x8x8xf32> to vector<8x8xf32>
    %391 = arith.addf %388, %390 : vector<8x8xf32>
    %392 = vector.extract_strided_slice %1 {offsets = [1, 0], sizes = [1, 8], strides = [1, 1]} : vector<2x8xf32> to vector<1x8xf32>
    %393 = vector.broadcast %392 : vector<1x8xf32> to vector<8x8xf32>
    %394 = arith.addf %391, %393 : vector<8x8xf32>
    %cst_140 = arith.constant dense<0xFF800000> : vector<8xf32>
    %395 = vector.multi_reduction <maximumf>, %394, %cst_140 [1] : vector<8x8xf32> to vector<8xf32>
    %396 = vector.shape_cast %395 : vector<8xf32> to vector<8x1xf32>
    %397 = vector.broadcast %396 : vector<8x1xf32> to vector<8x8xf32>
    %398 = arith.subf %394, %397 : vector<8x8xf32>
    %399 = math.exp %398 : vector<8x8xf32>
    %cst_141 = arith.constant dense<0.000000e+00> : vector<8xf32>
    %400 = vector.multi_reduction <add>, %399, %cst_141 [1] : vector<8x8xf32> to vector<8xf32>
    %401 = vector.shape_cast %400 : vector<8xf32> to vector<8x1xf32>
    %402 = tpu.reciprocal %401 {approx = true} : vector<8x1xf32> -> vector<8x1xf32>
    %403 = vector.broadcast %402 : vector<8x1xf32> to vector<8x8xf32>
    %404 = arith.mulf %399, %403 : vector<8x8xf32>
    %cst_142 = arith.constant dense<0.000000e+00> : vector<8x8xf32>
    %405 = tpu.matmul %404, %386, %cst_142 {dimension_numbers = #tpu.dot_dimension_numbers<[1], [0], [0], [1], [0, 0, 1, 1], [], []>} : vector<8x8xf32>, vector<8x8xf32>, vector<8x8xf32> -> vector<8x8xf32>
    %406 = arith.truncf %405 : vector<8x8xf32> to vector<8x8xbf16>
    %407 = vector.extract_strided_slice %280 {offsets = [0, 0], sizes = [8, 32], strides = [1, 1]} : vector<32x32xbf16> to vector<8x32xbf16>
    %cst_143 = arith.constant dense<0.000000e+00> : vector<8x32xf32>
    %408 = tpu.matmul %406, %407, %cst_143 {dimension_numbers = #tpu.dot_dimension_numbers<[1], [0], [0], [1], [0, 0, 1, 1], [], []>} : vector<8x8xbf16>, vector<8x32xbf16>, vector<8x32xf32> -> vector<8x32xf32>
    %409 = vector.extract_strided_slice %276 {offsets = [8, 8], sizes = [8, 8], strides = [1, 1]} : vector<16x32xf32> to vector<8x8xf32>
    %410 = vector.extract_strided_slice %277 {offsets = [8, 8], sizes = [8, 8], strides = [1, 1]} : vector<16x32xf32> to vector<8x8xf32>
    %411 = vector.extract_strided_slice %278 {offsets = [8, 8], sizes = [8, 8], strides = [1, 1]} : vector<16x32xf32> to vector<8x8xf32>
    %412 = tpu.transpose %410, [1, 0] : vector<8x8xf32> -> vector<8x8xf32>
    %cst_144 = arith.constant dense<0.000000e+00> : vector<8x8xf32>
    %413 = tpu.matmul %409, %412, %cst_144 {dimension_numbers = #tpu.dot_dimension_numbers<[1], [0], [0], [1], [0, 0, 1, 1], [], []>} : vector<8x8xf32>, vector<8x8xf32>, vector<8x8xf32> -> vector<8x8xf32>
    %c1_145 = arith.constant 1 : index
    %c0_146 = arith.constant 0 : index
    %c0_147 = arith.constant 0 : index
    %414 = vector.load %arg1[%c1_145, %c0_146, %c0_147] : memref<4x8x8xf32, #tpu.memory_space<vmem>>, vector<1x8x8xf32>
    %415 = vector.shape_cast %414 : vector<1x8x8xf32> to vector<8x8xf32>
    %416 = arith.addf %413, %415 : vector<8x8xf32>
    %417 = vector.extract_strided_slice %1 {offsets = [1, 0], sizes = [1, 8], strides = [1, 1]} : vector<2x8xf32> to vector<1x8xf32>
    %418 = vector.broadcast %417 : vector<1x8xf32> to vector<8x8xf32>
    %419 = arith.addf %416, %418 : vector<8x8xf32>
    %cst_148 = arith.constant dense<0xFF800000> : vector<8xf32>
    %420 = vector.multi_reduction <maximumf>, %419, %cst_148 [1] : vector<8x8xf32> to vector<8xf32>
    %421 = vector.shape_cast %420 : vector<8xf32> to vector<8x1xf32>
    %422 = vector.broadcast %421 : vector<8x1xf32> to vector<8x8xf32>
    %423 = arith.subf %419, %422 : vector<8x8xf32>
    %424 = math.exp %423 : vector<8x8xf32>
    %cst_149 = arith.constant dense<0.000000e+00> : vector<8xf32>
    %425 = vector.multi_reduction <add>, %424, %cst_149 [1] : vector<8x8xf32> to vector<8xf32>
    %426 = vector.shape_cast %425 : vector<8xf32> to vector<8x1xf32>
    %427 = tpu.reciprocal %426 {approx = true} : vector<8x1xf32> -> vector<8x1xf32>
    %428 = vector.broadcast %427 : vector<8x1xf32> to vector<8x8xf32>
    %429 = arith.mulf %424, %428 : vector<8x8xf32>
    %cst_150 = arith.constant dense<0.000000e+00> : vector<8x8xf32>
    %430 = tpu.matmul %429, %411, %cst_150 {dimension_numbers = #tpu.dot_dimension_numbers<[1], [0], [0], [1], [0, 0, 1, 1], [], []>} : vector<8x8xf32>, vector<8x8xf32>, vector<8x8xf32> -> vector<8x8xf32>
    %431 = arith.truncf %430 : vector<8x8xf32> to vector<8x8xbf16>
    %432 = vector.extract_strided_slice %280 {offsets = [8, 0], sizes = [8, 32], strides = [1, 1]} : vector<32x32xbf16> to vector<8x32xbf16>
    %cst_151 = arith.constant dense<0.000000e+00> : vector<8x32xf32>
    %433 = tpu.matmul %431, %432, %cst_151 {dimension_numbers = #tpu.dot_dimension_numbers<[1], [0], [0], [1], [0, 0, 1, 1], [], []>} : vector<8x8xbf16>, vector<8x32xbf16>, vector<8x32xf32> -> vector<8x32xf32>
    %434 = arith.addf %408, %433 : vector<8x32xf32>
    %435 = vector.extract_strided_slice %276 {offsets = [8, 16], sizes = [8, 8], strides = [1, 1]} : vector<16x32xf32> to vector<8x8xf32>
    %436 = vector.extract_strided_slice %277 {offsets = [8, 16], sizes = [8, 8], strides = [1, 1]} : vector<16x32xf32> to vector<8x8xf32>
    %437 = vector.extract_strided_slice %278 {offsets = [8, 16], sizes = [8, 8], strides = [1, 1]} : vector<16x32xf32> to vector<8x8xf32>
    %438 = tpu.transpose %436, [1, 0] : vector<8x8xf32> -> vector<8x8xf32>
    %cst_152 = arith.constant dense<0.000000e+00> : vector<8x8xf32>
    %439 = tpu.matmul %435, %438, %cst_152 {dimension_numbers = #tpu.dot_dimension_numbers<[1], [0], [0], [1], [0, 0, 1, 1], [], []>} : vector<8x8xf32>, vector<8x8xf32>, vector<8x8xf32> -> vector<8x8xf32>
    %c2_153 = arith.constant 2 : index
    %c0_154 = arith.constant 0 : index
    %c0_155 = arith.constant 0 : index
    %440 = vector.load %arg1[%c2_153, %c0_154, %c0_155] : memref<4x8x8xf32, #tpu.memory_space<vmem>>, vector<1x8x8xf32>
    %441 = vector.shape_cast %440 : vector<1x8x8xf32> to vector<8x8xf32>
    %442 = arith.addf %439, %441 : vector<8x8xf32>
    %443 = vector.extract_strided_slice %1 {offsets = [1, 0], sizes = [1, 8], strides = [1, 1]} : vector<2x8xf32> to vector<1x8xf32>
    %444 = vector.broadcast %443 : vector<1x8xf32> to vector<8x8xf32>
    %445 = arith.addf %442, %444 : vector<8x8xf32>
    %cst_156 = arith.constant dense<0xFF800000> : vector<8xf32>
    %446 = vector.multi_reduction <maximumf>, %445, %cst_156 [1] : vector<8x8xf32> to vector<8xf32>
    %447 = vector.shape_cast %446 : vector<8xf32> to vector<8x1xf32>
    %448 = vector.broadcast %447 : vector<8x1xf32> to vector<8x8xf32>
    %449 = arith.subf %445, %448 : vector<8x8xf32>
    %450 = math.exp %449 : vector<8x8xf32>
    %cst_157 = arith.constant dense<0.000000e+00> : vector<8xf32>
    %451 = vector.multi_reduction <add>, %450, %cst_157 [1] : vector<8x8xf32> to vector<8xf32>
    %452 = vector.shape_cast %451 : vector<8xf32> to vector<8x1xf32>
    %453 = tpu.reciprocal %452 {approx = true} : vector<8x1xf32> -> vector<8x1xf32>
    %454 = vector.broadcast %453 : vector<8x1xf32> to vector<8x8xf32>
    %455 = arith.mulf %450, %454 : vector<8x8xf32>
    %cst_158 = arith.constant dense<0.000000e+00> : vector<8x8xf32>
    %456 = tpu.matmul %455, %437, %cst_158 {dimension_numbers = #tpu.dot_dimension_numbers<[1], [0], [0], [1], [0, 0, 1, 1], [], []>} : vector<8x8xf32>, vector<8x8xf32>, vector<8x8xf32> -> vector<8x8xf32>
    %457 = arith.truncf %456 : vector<8x8xf32> to vector<8x8xbf16>
    %458 = vector.extract_strided_slice %280 {offsets = [16, 0], sizes = [8, 32], strides = [1, 1]} : vector<32x32xbf16> to vector<8x32xbf16>
    %cst_159 = arith.constant dense<0.000000e+00> : vector<8x32xf32>
    %459 = tpu.matmul %457, %458, %cst_159 {dimension_numbers = #tpu.dot_dimension_numbers<[1], [0], [0], [1], [0, 0, 1, 1], [], []>} : vector<8x8xbf16>, vector<8x32xbf16>, vector<8x32xf32> -> vector<8x32xf32>
    %460 = arith.addf %434, %459 : vector<8x32xf32>
    %461 = vector.extract_strided_slice %276 {offsets = [8, 24], sizes = [8, 8], strides = [1, 1]} : vector<16x32xf32> to vector<8x8xf32>
    %462 = vector.extract_strided_slice %277 {offsets = [8, 24], sizes = [8, 8], strides = [1, 1]} : vector<16x32xf32> to vector<8x8xf32>
    %463 = vector.extract_strided_slice %278 {offsets = [8, 24], sizes = [8, 8], strides = [1, 1]} : vector<16x32xf32> to vector<8x8xf32>
    %464 = tpu.transpose %462, [1, 0] : vector<8x8xf32> -> vector<8x8xf32>
    %cst_160 = arith.constant dense<0.000000e+00> : vector<8x8xf32>
    %465 = tpu.matmul %461, %464, %cst_160 {dimension_numbers = #tpu.dot_dimension_numbers<[1], [0], [0], [1], [0, 0, 1, 1], [], []>} : vector<8x8xf32>, vector<8x8xf32>, vector<8x8xf32> -> vector<8x8xf32>
    %c3_161 = arith.constant 3 : index
    %c0_162 = arith.constant 0 : index
    %c0_163 = arith.constant 0 : index
    %466 = vector.load %arg1[%c3_161, %c0_162, %c0_163] : memref<4x8x8xf32, #tpu.memory_space<vmem>>, vector<1x8x8xf32>
    %467 = vector.shape_cast %466 : vector<1x8x8xf32> to vector<8x8xf32>
    %468 = arith.addf %465, %467 : vector<8x8xf32>
    %469 = vector.extract_strided_slice %1 {offsets = [1, 0], sizes = [1, 8], strides = [1, 1]} : vector<2x8xf32> to vector<1x8xf32>
    %470 = vector.broadcast %469 : vector<1x8xf32> to vector<8x8xf32>
    %471 = arith.addf %468, %470 : vector<8x8xf32>
    %cst_164 = arith.constant dense<0xFF800000> : vector<8xf32>
    %472 = vector.multi_reduction <maximumf>, %471, %cst_164 [1] : vector<8x8xf32> to vector<8xf32>
    %473 = vector.shape_cast %472 : vector<8xf32> to vector<8x1xf32>
    %474 = vector.broadcast %473 : vector<8x1xf32> to vector<8x8xf32>
    %475 = arith.subf %471, %474 : vector<8x8xf32>
    %476 = math.exp %475 : vector<8x8xf32>
    %cst_165 = arith.constant dense<0.000000e+00> : vector<8xf32>
    %477 = vector.multi_reduction <add>, %476, %cst_165 [1] : vector<8x8xf32> to vector<8xf32>
    %478 = vector.shape_cast %477 : vector<8xf32> to vector<8x1xf32>
    %479 = tpu.reciprocal %478 {approx = true} : vector<8x1xf32> -> vector<8x1xf32>
    %480 = vector.broadcast %479 : vector<8x1xf32> to vector<8x8xf32>
    %481 = arith.mulf %476, %480 : vector<8x8xf32>
    %cst_166 = arith.constant dense<0.000000e+00> : vector<8x8xf32>
    %482 = tpu.matmul %481, %463, %cst_166 {dimension_numbers = #tpu.dot_dimension_numbers<[1], [0], [0], [1], [0, 0, 1, 1], [], []>} : vector<8x8xf32>, vector<8x8xf32>, vector<8x8xf32> -> vector<8x8xf32>
    %483 = arith.truncf %482 : vector<8x8xf32> to vector<8x8xbf16>
    %484 = vector.extract_strided_slice %280 {offsets = [24, 0], sizes = [8, 32], strides = [1, 1]} : vector<32x32xbf16> to vector<8x32xbf16>
    %cst_167 = arith.constant dense<0.000000e+00> : vector<8x32xf32>
    %485 = tpu.matmul %483, %484, %cst_167 {dimension_numbers = #tpu.dot_dimension_numbers<[1], [0], [0], [1], [0, 0, 1, 1], [], []>} : vector<8x8xbf16>, vector<8x32xbf16>, vector<8x32xf32> -> vector<8x32xf32>
    %486 = arith.addf %460, %485 : vector<8x32xf32>
    %487 = tpu.concatenate %383, %486 in 0 : vector<8x32xf32>, vector<8x32xf32> -> vector<16x32xf32>
    %488 = arith.addf %257, %487 : vector<16x32xf32>
    %c1_168 = arith.constant 1 : index
    %c0_169 = arith.constant 0 : index
    %c0_170 = arith.constant 0 : index
    %489 = vector.load %arg6[%c1_168, %c0_169, %c0_170] : memref<2x1x32xf32, #tpu.memory_space<vmem>>, vector<1x1x32xf32>
    %490 = vector.shape_cast %489 : vector<1x1x32xf32> to vector<1x32xf32>
    %491 = arith.mulf %488, %488 : vector<16x32xf32>
    %cst_171 = arith.constant dense<0.000000e+00> : vector<16xf32>
    %492 = vector.multi_reduction <add>, %491, %cst_171 [1] : vector<16x32xf32> to vector<16xf32>
    %493 = vector.shape_cast %492 : vector<16xf32> to vector<16x1xf32>
    %cst_172 = arith.constant 3.200000e+01 : f32
    %494 = vector.broadcast %cst_172 : f32 to vector<16x1xf32>
    %495 = arith.divf %493, %494 : vector<16x1xf32>
    %cst_173 = arith.constant 9.99999997E-7 : f32
    %496 = vector.broadcast %cst_173 : f32 to vector<16x1xf32>
    %497 = arith.addf %495, %496 : vector<16x1xf32>
    %498 = math.rsqrt %497 : vector<16x1xf32>
    %499 = vector.broadcast %498 : vector<16x1xf32> to vector<16x32xf32>
    %500 = arith.mulf %488, %499 : vector<16x32xf32>
    %501 = vector.broadcast %490 : vector<1x32xf32> to vector<16x32xf32>
    %502 = arith.mulf %500, %501 : vector<16x32xf32>
    %503 = arith.truncf %502 : vector<16x32xf32> to vector<16x32xbf16>
    %c1_174 = arith.constant 1 : index
    %c0_175 = arith.constant 0 : index
    %c0_176 = arith.constant 0 : index
    %504 = vector.load %arg7[%c1_174, %c0_175, %c0_176] : memref<2x32x64xbf16, #tpu.memory_space<vmem>>, vector<1x32x64xbf16>
    %505 = vector.shape_cast %504 : vector<1x32x64xbf16> to vector<32x64xbf16>
    %cst_177 = arith.constant dense<0.000000e+00> : vector<16x64xf32>
    %506 = tpu.matmul %503, %505, %cst_177 {dimension_numbers = #tpu.dot_dimension_numbers<[1], [0], [0], [1], [0, 0, 1, 1], [], []>} : vector<16x32xbf16>, vector<32x64xbf16>, vector<16x64xf32> -> vector<16x64xf32>
    %cst_178 = arith.constant 0.000000e+00 : f32
    %507 = vector.broadcast %cst_178 : f32 to vector<16x64xf32>
    %508 = arith.maximumf %506, %507 : vector<16x64xf32>
    %509 = arith.truncf %508 : vector<16x64xf32> to vector<16x64xbf16>
    %c1_179 = arith.constant 1 : index
    %c0_180 = arith.constant 0 : index
    %c0_181 = arith.constant 0 : index
    %510 = vector.load %arg8[%c1_179, %c0_180, %c0_181] : memref<2x64x32xbf16, #tpu.memory_space<vmem>>, vector<1x64x32xbf16>
    %511 = vector.shape_cast %510 : vector<1x64x32xbf16> to vector<64x32xbf16>
    %cst_182 = arith.constant dense<0.000000e+00> : vector<16x32xf32>
    %512 = tpu.matmul %509, %511, %cst_182 {dimension_numbers = #tpu.dot_dimension_numbers<[1], [0], [0], [1], [0, 0, 1, 1], [], []>} : vector<16x64xbf16>, vector<64x32xbf16>, vector<16x32xf32> -> vector<16x32xf32>
    %513 = arith.addf %488, %512 : vector<16x32xf32>
    %c0_183 = arith.constant 0 : index
    %c0_184 = arith.constant 0 : index
    %514 = vector.load %arg9[%c0_183, %c0_184] : memref<1x32xf32, #tpu.memory_space<vmem>>, vector<1x32xf32>
    %515 = arith.mulf %513, %513 : vector<16x32xf32>
    %cst_185 = arith.constant dense<0.000000e+00> : vector<16xf32>
    %516 = vector.multi_reduction <add>, %515, %cst_185 [1] : vector<16x32xf32> to vector<16xf32>
    %517 = vector.shape_cast %516 : vector<16xf32> to vector<16x1xf32>
    %cst_186 = arith.constant 3.200000e+01 : f32
    %518 = vector.broadcast %cst_186 : f32 to vector<16x1xf32>
    %519 = arith.divf %517, %518 : vector<16x1xf32>
    %cst_187 = arith.constant 9.99999997E-7 : f32
    %520 = vector.broadcast %cst_187 : f32 to vector<16x1xf32>
    %521 = arith.addf %519, %520 : vector<16x1xf32>
    %522 = math.rsqrt %521 : vector<16x1xf32>
    %523 = vector.broadcast %522 : vector<16x1xf32> to vector<16x32xf32>
    %524 = arith.mulf %513, %523 : vector<16x32xf32>
    %525 = vector.broadcast %514 : vector<1x32xf32> to vector<16x32xf32>
    %526 = arith.mulf %524, %525 : vector<16x32xf32>
    %c0_188 = arith.constant 0 : index
    %c0_189 = arith.constant 0 : index
    %527 = vector.load %arg10[%c0_188, %c0_189] : memref<2x16xf32, #tpu.memory_space<vmem>>, vector<2x16xf32>
    %cst_190 = arith.constant dense<0.000000e+00> : vector<2x32xf32>
    %528 = tpu.matmul %527, %526, %cst_190 {dimension_numbers = #tpu.dot_dimension_numbers<[1], [0], [0], [1], [0, 0, 1, 1], [], []>} : vector<2x16xf32>, vector<16x32xf32>, vector<2x32xf32> -> vector<2x32xf32>
    %529 = arith.truncf %528 : vector<2x32xf32> to vector<2x32xbf16>
    %c0_191 = arith.constant 0 : index
    %c0_192 = arith.constant 0 : index
    %530 = vector.load %arg11[%c0_191, %c0_192] : memref<32x256xbf16, #tpu.memory_space<vmem>>, vector<32x256xbf16>
    %cst_193 = arith.constant dense<0.000000e+00> : vector<2x256xf32>
    %531 = tpu.matmul %529, %530, %cst_193 {dimension_numbers = #tpu.dot_dimension_numbers<[1], [0], [0], [1], [0, 0, 1, 1], [], []>} : vector<2x32xbf16>, vector<32x256xbf16>, vector<2x256xf32> -> vector<2x256xf32>
    %c0_194 = arith.constant 0 : index
    %c0_195 = arith.constant 0 : index
    %532 = vector.load %arg12[%c0_194, %c0_195] : memref<1x256xf32, #tpu.memory_space<vmem>>, vector<1x256xf32>
    %533 = vector.broadcast %532 : vector<1x256xf32> to vector<2x256xf32>
    %534 = arith.addf %531, %533 : vector<2x256xf32>
    %cst_196 = arith.constant 0.000000e+00 : f32
    %535 = vector.broadcast %cst_196 : f32 to vector<2x256xf32>
    %536 = arith.maximumf %534, %535 : vector<2x256xf32>
    %537 = arith.truncf %536 : vector<2x256xf32> to vector<2x256xbf16>
    %c0_197 = arith.constant 0 : index
    %c0_198 = arith.constant 0 : index
    %538 = vector.load %arg13[%c0_197, %c0_198] : memref<256x3xbf16, #tpu.memory_space<vmem>>, vector<256x3xbf16>
    %cst_199 = arith.constant dense<0.000000e+00> : vector<2x3xf32>
    %539 = tpu.matmul %537, %538, %cst_199 {dimension_numbers = #tpu.dot_dimension_numbers<[1], [0], [0], [1], [0, 0, 1, 1], [], []>} : vector<2x256xbf16>, vector<256x3xbf16>, vector<2x3xf32> -> vector<2x3xf32>
    %c0_200 = arith.constant 0 : index
    %c0_201 = arith.constant 0 : index
    %540 = vector.load %arg14[%c0_200, %c0_201] : memref<1x3xf32, #tpu.memory_space<vmem>>, vector<1x3xf32>
    %541 = vector.broadcast %540 : vector<1x3xf32> to vector<2x3xf32>
    %542 = arith.addf %539, %541 : vector<2x3xf32>
    %c0_202 = arith.constant 0 : index
    %c0_203 = arith.constant 0 : index
    %543 = vector.load %arg15[%c0_202, %c0_203] : memref<2x3xf32, #tpu.memory_space<vmem>>, vector<2x3xf32>
    tpu.vector_store %arg15[%c0_202, %c0_203], %542 {strides = array<i32>} : memref<2x3xf32, #tpu.memory_space<vmem>>, vector<2x3xf32>,
    return
  }
}

</mosaic_0001>

<bundles_post_ra>
// kernel: custom_t5_forward.1
= control target key start
LH: loop header
LB: loop body
LE: loop exit
PB: predicated region body
PF: predicated region fallthrough
CT: control target
= control target key end

     0   :  { %vm58_vm0 = vcmask 261120   ;;  %s5967_s0 = inlined_call_operand.vmem [shape: f32[16,32], index: 0, kind: input, shape index: {}]   ;;  %s5968_s1 = inlined_call_operand.vmem [shape: f32[4,8,8], index: 1, kind: input, shape index: {}]   ;;  %s5969_s2 = inlined_call_operand.vmem [shape: f32[2,8], index: 2, kind: input, shape index: {}]   ;;  %s5970_s3 = inlined_call_operand.vmem [shape: f32[2,1,32], index: 3, kind: input, shape index: {}]   ;;  %s5971_s4 = inlined_call_operand.vmem [shape: bf16[2,32,96], index: 4, kind: input, shape index: {}]   ;;  %s5972_s5 = inlined_call_operand.vmem [shape: bf16[2,32,32], index: 5, kind: input, shape index: {}]   ;;  %s5973_s6 = inlined_call_operand.vmem [shape: f32[2,1,32], index: 6, kind: input, shape index: {}]   ;;  %s5974_s7 = inlined_call_operand.vmem [shape: bf16[2,32,64], index: 7, kind: input, shape index: {}]   ;;  %s5975_s8 = inlined_call_operand.vmem [shape: bf16[2,64,32], index: 8, kind: input, shape index: {}]   ;;  %s5976_s9 = inlined_call_operand.vmem [shape: f32[1,32], index: 9, kind: input, shape index: {}]   ;;  %s5977_s10 = inlined_call_operand.vmem [shape: f32[2,16], index: 10, kind: input, shape index: {}]   ;;  %s5978_s11 = inlined_call_operand.vmem [shape: bf16[32,256], index: 11, kind: input, shape index: {}]   ;;  %s5979_s12 = inlined_call_operand.vmem [shape: f32[1,256], index: 12, kind: input, shape index: {}]   ;;  %s5980_s13 = inlined_call_operand.vmem [shape: bf16[256,3], index: 13, kind: input, shape index: {}]   ;;  %s5981_s14 = inlined_call_operand.vmem [shape: f32[1,3], index: 14, kind: input, shape index: {}]   ;;  %s5982_s15 = inlined_call_operand.hbm [shape: f32[2,3], index: 15, kind: output, shape index: {}]  }
   0x1   :  { %v5232_v0 = vld [vmem:[%s5967_s0] sm:$0xff]  ;;  %v5237_v1 = vld [vmem:[%s5967_s0 + $0x8] sm:$0xff] }
   0x2   :  { %v56_v2 = vmul.f32 %v5232_v0, %v5232_v0  ;;  %v57_v3 = vmul.f32 %v5237_v1, %v5237_v1 }
   0x4   :  { %v59_v4 = vsel %vm58_vm0, %v56_v2, 0.0  ;;  %v62_v5 = vsel %vm58_vm0, %v57_v3, 0.0 }
   0x5   :  { %60 = vadd.xlane.f32.xlu0 %v59_v4 }
   0x9   :  { %63 = vadd.xlane.f32.xlu0 %v62_v5 }
   0xa   :  { %20 = vsyncpa [#allocation3], 0  ;;  %v4983_v6 = vld [vmem:[%s5971_s4] sm:$0xff]   ;;  %v5133_v7 = vmov 0.0   ;;  %vm5134_vm1 = vmmov 0   ;;  %v4984_v8 = vld [vmem:[%s5971_s4 + $0x8] sm:$0xff]   ;;  %v226_v29 = vlaneseq }
   0xb   :  { %4645 = vmatprep.subr.bf16.mxu1 %v5133_v7  ;;  %4649 = vmatprep.mubr.msk.bf16.mxu1 %vm5134_vm1, %v5133_v7  ;;  %v4363_v18 = vld [vmem:[%s5970_s3] ss:$0 sm:$0xff]  ;;  %s5135_s27 = smov 64   ;;  %s5136_s28 = smov 96   ;;  %vm151_vm2 = vcmask 64512   ;;  %v5319_v52 = vld [vmem:[%s5968_s1 + $0x8] sm:$0xff] }
   0xc   :  { %4646 = vmatpush3.bf16.msra.mxu1 %v4983_v6  ;;  %4668 = vmatprep.subr.mxu0 %v5133_v7  ;;  %s5137_s29 = smov 88   ;;  %v5284_v30 = vshrl.u32 %v226_v29, 7  ;;  %v5290_v32 = vld [vmem:[%s5969_s2] sm:$0x3]  ;;  %s5138_s2 = smov 120   ;;  %vm491_vm3 = vcmask 1043456  }
   0xd   :  { %4647 = vmatprep.subr.bf16.mxu1 %v5133_v7  ;;  %4670 = vmatprep.mubr.msk.f32.mxu0 %vm5134_vm1, %v5133_v7  ;;  %v5295_v33 = vld [vmem:[%s5968_s1] sm:$0xff]  ;;  %s5139_s21 = smov 56   ;;  %s5140_s22 = smov 80   ;;  %vm1981_vm4 = vcmask 523264   ;;  %vm4013_vm5 = vcmask 130048   ;;  %vm4347_vm6 = vcmask 17408  }
   0xe   :  { %v228_v31 = vsub.s32 0, %v5284_v30  ;;  %s5141_s23 = smov 112   ;;  %s5142_s0 = smov 48   ;;  %v144_v2 = vld [vmem:[%s5972_s5 + $0x4] sm:$0xf] }
   0xf   :  { %s5985_s24 = smov 72   ;;  %v5340_v3 = vsel %vm491_vm3, %v144_v2, 0  ;;  %v143_v5 = vld [vmem:[%s5972_s5] sm:$0xf]  ;;  %s5144_s19 = smov 104  }
  0x10   :  { %4648 = vmatpush3.bf16.msra.mxu1 %v4984_v8  ;;  %v5300_v34 = vrot.slane %v5290_v32, %v228_v31  ;;  %s5983_s16 = smov 40   ;;  %s5987_s17 = smov 72  }
  0x11   :  { %4653 = vmatprep.subr.mxu1 %v5133_v7 }
  0x92   :  { %v61_v9 = vpop.xlane.xlu0 %60 }
  0x93   :  { %v66_v10 = vmul.f32 0.03125, %v61_v9  ;;  %v5348_v9 = vsel %vm491_vm3, %v143_v5, 0  ;;  %v146_v5 = vld [vmem:[%s5972_s5 + $0xc] sm:$0xf] }
  0x95   :  { %v68_v11 = vadd.f32 1e-06, %v66_v10 }
  0x96   :  { %v64_v12 = vpop.xlane.xlu0 %63 }
  0x97   :  { %5021 = vrsqrt.f32 %v68_v11  ;;  %v67_v13 = vmul.f32 0.03125, %v64_v12 }
  0x99   :  { %v69_v14 = vadd.f32 1e-06, %v67_v13 }
  0x9b   :  { %5023 = vrsqrt.f32 %v69_v14 }
  0xa1   :  { %v5022_v15 = vpop.eup %5021 }
  0xa2   :  { %v72_v16 = vmul.f32 %v5022_v15, %v5232_v0 }
  0xa4   :  { %v80_v20 = vmul.f32 %v4363_v18, %v72_v16 }
  0xa5   :  { %v5024_v17 = vpop.eup %5023 }
  0xa6   :  { %v73_v19 = vmul.f32 %v5024_v17, %v5237_v1 }
  0xa8   :  { %v81_v21 = vmul.f32 %v4363_v18, %v73_v19 }
  0xaa   :  { %v82_v22 = vpack.c.bf16 %v81_v21, %v80_v20 }
  0xac   :  { %4650 = vmatmul.mubr.msk.bf16.vlgmr.msra.gmra.mrb[0].mxu1 %vm58_vm0, %v82_v22 }
  0xad   :  { %4655 = vmatprep.mubr.msk.f32.mxu1 %vm5134_vm1, %v5133_v7 }
 0x17f   :  { %v5267_v23 = vpop.f32.mrb[0].mxu1 }
 0x180   :  { %242 = vrot.lane.b32.xlu0 %v5267_v23, %s5135_s27  ;;  %149 = vrot.lane.b32.xlu1 %v5267_v23, %s5136_s28  ;;  %v4651_v24 = vpop.f32.mrb[1].mxu1 }
 0x181   :  { %v5273_v25 = vpop.f32.mrb[2].mxu1 }
 0x182   :  { %v4652_v26 = vpop.f32.mrb[3].mxu1 }
 0x184   :  { %323 = vrot.lane.b32.xlu0 %v5267_v23, %s5137_s29 }
 0x1f2   :  { %v150_v27 = vpop.permute.xlu1 %149  ;;  %v243_v28 = vpop.permute.xlu0 %242 }
 0x1f3   :  { %4654 = vmatpush3.xpose.msk.msra.mxu1 %vm151_vm2, %v150_v27 }
 0x1f4   :  { %4658 = vmatprep.subr.mxu1 %v5133_v7 }
 0x1f6   :  { %4656 = vmatmul.mubr.msk.f32.vlgmr.msra.gmra.mrb[4].mxu1 %vm151_vm2, %v5267_v23  ;;  %v324_v45 = vpop.permute.xlu0 %323 }
 0x1f7   :  { %4659 = vmatpush3.msra.mxu1 %v243_v28  ;;  %4660 = vmatprep.mubr.msk.f32.mxu1 %vm5134_vm1, %v5133_v7  ;;  %v5372_v28 = vld [vmem:[%s5968_s1 + $0x10] sm:$0xff] }
 0x1f8   :  { %4663 = vmatprep.subr.mxu1 %v5133_v7 }
 0x2c9   :  { %v222_v35 = vpop.f32.mrb[4].mxu1 }
 0x2ca   :  { %v223_v36 = vadd.f32 %v222_v35, %v5295_v33  ;;  %v4657_v37 = vpop.f32.mrb[5].mxu1 }
 0x2cc   :  { %v230_v38 = vadd.f32 %v5300_v34, %v223_v36 }
 0x2ce   :  { %v231_v39 = vsel %vm151_vm2, %v230_v38, -inf }
 0x2cf   :  { %232 = vmax.xlane.f32.xlu1 %v231_v39 }
 0x35c   :  { %v233_v40 = vpop.xlane.xlu1 %232 }
 0x35d   :  { %v234_v41 = vsub.f32 %v230_v38, %v233_v40 }
 0x35f   :  { %v235_v42 = vmul.f32 1.442695, %v234_v41 }
 0x361   :  { %5025 = vpow2.f32 %v235_v42 }
 0x36b   :  { %v5026_v43 = vpop.eup %5025 }
 0x36c   :  { %v237_v44 = vsel %vm151_vm2, %v5026_v43, 0.0 }
 0x36d   :  { %238 = vadd.xlane.f32.xlu0 %v237_v44 }
 0x383   :  { %321 = vrot.lane.b32.xlu0 %v5267_v23, %s5138_s2 }
 0x3fa   :  { %v239_v46 = vpop.xlane.xlu0 %238 }
 0x3fb   :  { %5027 = vrcp.f32 %v239_v46 }
 0x3fe   :  { %v322_v49 = vpop.permute.xlu0 %321 }
 0x405   :  { %v5028_v47 = vpop.eup %5027 }
 0x406   :  { %v241_v48 = vmul.f32 %v5028_v47, %v5026_v43 }
 0x408   :  { %4661 = vmatmul.mubr.msk.f32.vlgmr.msra.gmra.mrb[6].mxu1 %vm151_vm2, %v241_v48 }
 0x409   :  { %4664 = vmatpush3.xpose.msk.msra.mxu1 %vm151_vm2, %v324_v45  ;;  %4665 = vmatprep.mubr.msk.f32.mxu1 %vm5134_vm1, %v5133_v7 }
 0x40a   :  { %4673 = vmatprep.subr.bf16.mxu1 %v5133_v7 }
 0x40c   :  { %4666 = vmatmul.mubr.msk.f32.vlgmr.msra.gmra.mrb[8].mxu1 %vm151_vm2, %v322_v49  ;;  %v145_v49 = vld [vmem:[%s5972_s5 + $0x8] sm:$0xf] }
 0x40d   :  { %4675 = vmatprep.mubr.msk.bf16.mxu1 %vm5134_vm1, %v5133_v7  ;;  %4674 = vmatpush3.bf16.msra.mxu1 %v5340_v3 }
 0x40e   :  { %4685 = vmatprep.subr.mxu1 %v5133_v7 }
 0x4db   :  { %v314_v50 = vpop.f32.mrb[6].mxu1 }
 0x4dc   :  { %v4662_v51 = vpop.f32.mrb[7].mxu1  ;;  %v318_v10 = vpack.c.bf16 %v314_v50, %v314_v50  ;;  %v5392_v50 = vsel %vm491_vm3, %v145_v49, 0 }
 0x4df   :  { %v395_v53 = vpop.f32.mrb[8].mxu1 }
 0x4e0   :  { %v396_v54 = vadd.f32 %v5319_v52, %v395_v53  ;;  %v4667_v55 = vpop.f32.mrb[9].mxu1 }
 0x4e1   :  { %v5399_v55 = vld [vmem:[%s5968_s1 + $0x18] sm:$0xff] }
 0x4e2   :  { %v399_v56 = vadd.f32 %v396_v54, %v5300_v34 }
 0x4e4   :  { %v400_v57 = vsel %vm151_vm2, %v399_v56, -inf }
 0x4e5   :  { %401 = vmax.xlane.f32.xlu1 %v400_v57 }
 0x4f6   :  { %411 = vrot.lane.b32.xlu1 %v5267_v23, %s5139_s21 }
 0x4fa   :  { %585 = vrot.lane.b32.xlu1 %v5267_v23, %s5140_s22 }
 0x4fe   :  { %583 = vrot.lane.b32.xlu1 %v5267_v23, %s5141_s23 }
 0x572   :  { %v402_v58 = vpop.xlane.xlu1 %401 }
 0x573   :  { %v403_v59 = vsub.f32 %v399_v56, %v402_v58 }
 0x575   :  { %v404_v60 = vmul.f32 1.442695, %v403_v59 }
 0x576   :  { %v412_v61 = vpop.permute.xlu1 %411 }
 0x577   :  { %5029 = vpow2.f32 %v404_v60  ;;  %4669 = vmatpush3.msra.mxu0 %v412_v61 }
 0x578   :  { %4679 = vmatprep.subr.bf16.mxu0 %v5133_v7 }
 0x57a   :  { %v586_v15 = vpop.permute.xlu1 %585 }
 0x57e   :  { %v584_v20 = vpop.permute.xlu1 %583 }
 0x581   :  { %v5030_v62 = vpop.eup %5029 }
 0x582   :  { %v406_v63 = vsel %vm151_vm2, %v5030_v62, 0.0 }
 0x583   :  { %407 = vadd.xlane.f32.xlu0 %v406_v63 }
 0x599   :  { %673 = vrot.lane.b32.xlu0 %v5267_v23, %s5142_s0 }
 0x59d   :  { %801 = vrot.lane.b32.xlu0 %v5267_v23, %s5985_s24 }
 0x610   :  { %v408_v4 = vpop.xlane.xlu0 %407 }
 0x611   :  { %5031 = vrcp.f32 %v408_v4 }
 0x614   :  { %v674_v11 = vpop.permute.xlu0 %673 }
 0x618   :  { %v802_v44 = vpop.permute.xlu0 %801 }
 0x61b   :  { %v5032_v6 = vpop.eup %5031 }
 0x61c   :  { %v410_v8 = vmul.f32 %v5032_v6, %v5030_v62  ;;  %v5421_v6 = vsel %vm491_vm3, %v146_v5, 0 }
 0x61e   :  { %4671 = vmatmul.mubr.msk.f32.vlgmr.msra.gmra.mrb[0].mxu0 %vm151_vm2, %v410_v8 }
 0x61f   :  { %4680 = vmatpush3.bf16.msra.mxu0 %v5348_v9  ;;  %4681 = vmatprep.mubr.msk.bf16.mxu0 %vm5134_vm1, %v5133_v7 }
 0x620   :  { %4690 = vmatprep.subr.mxu0 %v5133_v7 }
 0x622   :  { %4682 = vmatmul.mubr.msk.bf16.vlgmr.msra.gmra.mrb[4].mxu0 %vm151_vm2, %v318_v10 }
 0x623   :  { %4691 = vmatpush3.msra.mxu0 %v674_v11  ;;  %4692 = vmatprep.mubr.msk.f32.mxu0 %vm5134_vm1, %v5133_v7 }
 0x624   :  { %4701 = vmatprep.subr.mxu0 %v5133_v7 }
 0x6f1   :  { %v483_v12 = vpop.f32.mrb[0].mxu0 }
 0x6f2   :  { %v487_v13 = vpack.c.bf16 %v483_v12, %v483_v12  ;;  %v4672_v14 = vpop.f32.mrb[1].mxu0 }
 0x6f4   :  { %4676 = vmatmul.mubr.msk.bf16.vlgmr.msra.gmra.mrb[12].mxu1 %vm151_vm2, %v487_v13 }
 0x6f5   :  { %4686 = vmatpush3.xpose.msk.msra.mxu1 %vm151_vm2, %v586_v15  ;;  %v575_v16 = vpop.f32.mrb[4].mxu0  ;;  %4687 = vmatprep.mubr.msk.f32.mxu1 %vm5134_vm1, %v5133_v7 }
 0x6f6   :  { %v4683_v17 = vpop.f32.mrb[5].mxu0  ;;  %4695 = vmatprep.subr.bf16.mxu1 %v5133_v7 }
 0x6f7   :  { %v578_v18 = vpop.f32.mrb[6].mxu0 }
 0x6f8   :  { %v4684_v19 = vpop.f32.mrb[7].mxu0  ;;  %v1092_v18 = vsub.s32 1, %v5284_v30 }
 0x6fc   :  { %4688 = vmatmul.mubr.msk.f32.vlgmr.msra.gmra.mrb[10].mxu1 %vm151_vm2, %v584_v20 }
 0x6fd   :  { %4697 = vmatprep.mubr.msk.bf16.mxu1 %vm5134_vm1, %v5133_v7  ;;  %4696 = vmatpush3.bf16.msra.mxu1 %v5392_v50 }
 0x6fe   :  { %4711 = vmatprep.subr.bf16.mxu1 %v5133_v7 }
 0x7c7   :  { %v529_v21 = vpop.f32.mrb[12].mxu1 }
 0x7c8   :  { %v5367_v22 = vadd.f32 %v575_v16, %v529_v21  ;;  %v4677_v24 = vpop.f32.mrb[13].mxu1 }
 0x7c9   :  { %v532_v26 = vpop.f32.mrb[14].mxu1  ;;  %v5440_v24 = vrot.slane %v5290_v32, %v1092_v18 }
 0x7ca   :  { %v4678_v27 = vpop.f32.mrb[15].mxu1 }
 0x7cf   :  { %v657_v29 = vpop.f32.mrb[10].mxu1 }
 0x7d0   :  { %v658_v35 = vadd.f32 %v5372_v28, %v657_v29  ;;  %v4689_v36 = vpop.f32.mrb[11].mxu1 }
 0x7d2   :  { %v661_v37 = vadd.f32 %v658_v35, %v5300_v34 }
 0x7d4   :  { %v662_v38 = vsel %vm151_vm2, %v661_v37, -inf }
 0x7d5   :  { %663 = vmax.xlane.f32.xlu1 %v662_v38 }
 0x862   :  { %v664_v39 = vpop.xlane.xlu1 %663 }
 0x863   :  { %v665_v40 = vsub.f32 %v661_v37, %v664_v39 }
 0x865   :  { %v666_v41 = vmul.f32 1.442695, %v665_v40 }
 0x867   :  { %5033 = vpow2.f32 %v666_v41 }
 0x871   :  { %v5034_v42 = vpop.eup %5033 }
 0x872   :  { %v668_v43 = vsel %vm151_vm2, %v5034_v42, 0.0 }
 0x873   :  { %669 = vadd.xlane.f32.xlu0 %v668_v43 }
 0x889   :  { %799 = vrot.lane.b32.xlu0 %v5267_v23, %s5144_s19 }
 0x900   :  { %v670_v45 = vpop.xlane.xlu0 %669 }
 0x901   :  { %5035 = vrcp.f32 %v670_v45 }
 0x904   :  { %v800_v48 = vpop.permute.xlu0 %799 }
 0x90b   :  { %v5036_v46 = vpop.eup %5035 }
 0x90c   :  { %v672_v47 = vmul.f32 %v5036_v46, %v5034_v42 }
 0x90e   :  { %4693 = vmatmul.mubr.msk.f32.vlgmr.msra.gmra.mrb[2].mxu0 %vm151_vm2, %v672_v47 }
 0x90f   :  { %4702 = vmatpush3.xpose.msk.msra.mxu0 %vm151_vm2, %v802_v44  ;;  %4703 = vmatprep.mubr.msk.f32.mxu0 %vm5134_vm1, %v5133_v7 }
 0x910   :  { %4706 = vmatprep.subr.mxu0 %v5133_v7 }
 0x912   :  { %4704 = vmatmul.mubr.msk.f32.vlgmr.msra.gmra.mrb[8].mxu0 %vm151_vm2, %v800_v48 }
 0x913   :  { %4708 = vmatprep.mubr.msk.f32.mxu0 %vm5134_vm1, %v5133_v7 }
 0x9e1   :  { %v745_v51 = vpop.f32.mrb[2].mxu0 }
 0x9e2   :  { %v749_v53 = vpack.c.bf16 %v745_v51, %v745_v51  ;;  %v4694_v54 = vpop.f32.mrb[3].mxu0 }
 0x9e4   :  { %4698 = vmatmul.mubr.msk.bf16.vlgmr.msra.gmra.mrb[16].mxu1 %vm151_vm2, %v749_v53 }
 0x9e5   :  { %v873_v56 = vpop.f32.mrb[8].mxu0  ;;  %4713 = vmatprep.mubr.msk.bf16.mxu1 %vm5134_vm1, %v5133_v7  ;;  %4712 = vmatpush3.bf16.msra.mxu1 %v5421_v6 }
 0x9e6   :  { %v874_v57 = vadd.f32 %v5399_v55, %v873_v56  ;;  %v4705_v58 = vpop.f32.mrb[9].mxu0  ;;  %4727 = vmatprep.subr.mxu1 %v5133_v7 }
 0x9e8   :  { %v877_v59 = vadd.f32 %v874_v57, %v5300_v34 }
 0x9ea   :  { %v878_v60 = vsel %vm151_vm2, %v877_v59, -inf }
 0x9eb   :  { %879 = vmax.xlane.f32.xlu1 %v878_v60 }
 0x9fc   :  { %889 = vrot.lane.b32.xlu1 %v5267_v23, %s5983_s16 }
 0xa00   :  { %1014 = vrot.lane.b32.xlu1 %v5273_v25, %s5136_s28 }
 0xa04   :  { %1185 = vrot.lane.b32.xlu1 %v5273_v25, %s5137_s29 }
 0xa08   :  { %1183 = vrot.lane.b32.xlu1 %v5273_v25, %s5138_s2 }
 0xa78   :  { %v880_v61 = vpop.xlane.xlu1 %879 }
 0xa79   :  { %v881_v62 = vsub.f32 %v877_v59, %v880_v61 }
 0xa7b   :  { %v882_v63 = vmul.f32 1.442695, %v881_v62 }
 0xa7c   :  { %v890_v2 = vpop.permute.xlu1 %889 }
 0xa7d   :  { %5037 = vpow2.f32 %v882_v63  ;;  %4707 = vmatpush3.msra.mxu0 %v890_v2 }
 0xa7e   :  { %4717 = vmatprep.subr.mxu0 %v5133_v7 }
 0xa80   :  { %v1015_v17 = vpop.permute.xlu1 %1014 }
 0xa87   :  { %v5038_v4 = vpop.eup %5037 }
 0xa88   :  { %v884_v23 = vsel %vm151_vm2, %v5038_v4, 0.0 }
 0xa89   :  { %885 = vadd.xlane.f32.xlu0 %v884_v23 }
 0xab7   :  { %v790_v8 = vpop.f32.mrb[16].mxu1 }
 0xab8   :  { %v796_v10 = vadd.f32 %v790_v8, %v5367_v22  ;;  %v4699_v11 = vpop.f32.mrb[17].mxu1  ;;  %v1186_v22 = vpop.permute.xlu1 %1185 }
 0xab9   :  { %v793_v12 = vpop.f32.mrb[18].mxu1 }
 0xaba   :  { %v4700_v13 = vpop.f32.mrb[19].mxu1 }
 0xabc   :  { %v1184_v37 = vpop.permute.xlu1 %1183 }
 0xb16   :  { %v886_v14 = vpop.xlane.xlu0 %885 }
 0xb17   :  { %5039 = vrcp.f32 %v886_v14 }
 0xb21   :  { %v5040_v15 = vpop.eup %5039 }
 0xb22   :  { %v888_v16 = vmul.f32 %v5040_v15, %v5038_v4 }
 0xb24   :  { %4709 = vmatmul.mubr.msk.f32.vlgmr.msra.gmra.mrb[10].mxu0 %vm151_vm2, %v888_v16 }
 0xb25   :  { %4718 = vmatpush3.xpose.msk.msra.mxu0 %vm151_vm2, %v1015_v17  ;;  %4719 = vmatprep.mubr.msk.f32.mxu0 %vm5134_vm1, %v5133_v7 }
 0xb26   :  { %4722 = vmatprep.subr.mxu0 %v5133_v7 }
 0xb28   :  { %4720 = vmatmul.mubr.msk.f32.vlgmr.msra.gmra.mrb[12].mxu0 %vm151_vm2, %v5273_v25 }
 0xb29   :  { %4724 = vmatprep.mubr.msk.f32.mxu0 %vm5134_vm1, %v5133_v7 }
 0xbf7   :  { %v961_v19 = vpop.f32.mrb[10].mxu0 }
 0xbf8   :  { %v965_v20 = vpack.c.bf16 %v961_v19, %v961_v19  ;;  %v4710_v21 = vpop.f32.mrb[11].mxu0 }
 0xbfa   :  { %4714 = vmatmul.mubr.msk.bf16.vlgmr.msra.gmra.mrb[20].mxu1 %vm151_vm2, %v965_v20 }
 0xbfb   :  { %4728 = vmatpush3.xpose.msk.msra.mxu1 %vm151_vm2, %v1186_v22  ;;  %v1086_v26 = vpop.f32.mrb[12].mxu0  ;;  %4729 = vmatprep.mubr.msk.f32.mxu1 %vm5134_vm1, %v5133_v7 }
 0xbfc   :  { %v1087_v27 = vadd.f32 %v1086_v26, %v5295_v33  ;;  %v4721_v29 = vpop.f32.mrb[13].mxu0  ;;  %4737 = vmatprep.subr.bf16.mxu1 %v5133_v7 }
 0xbfe   :  { %v1094_v35 = vadd.f32 %v5440_v24, %v1087_v27 }
 0xc00   :  { %v1095_v36 = vsel %vm151_vm2, %v1094_v35, -inf }
 0xc01   :  { %1096 = vmax.xlane.f32.xlu0 %v1095_v36 }
 0xc02   :  { %4730 = vmatmul.mubr.msk.f32.vlgmr.msra.gmra.mrb[24].mxu1 %vm151_vm2, %v1184_v37 }
 0xc03   :  { %4738 = vmatpush3.bf16.msra.mxu1 %v5340_v3  ;;  %4739 = vmatprep.mubr.msk.bf16.mxu1 %vm5134_vm1, %v5133_v7 }
 0xc04   :  { %4749 = vmatprep.subr.mxu1 %v5133_v7 }
 0xc8e   :  { %v1097_v32 = vpop.xlane.xlu0 %1096 }
 0xc8f   :  { %v1098_v38 = vsub.f32 %v1094_v35, %v1097_v32 }
 0xc91   :  { %v1099_v39 = vmul.f32 1.442695, %v1098_v38 }
 0xc93   :  { %5041 = vpow2.f32 %v1099_v39 }
 0xc9d   :  { %v5042_v40 = vpop.eup %5041 }
 0xc9e   :  { %v1101_v41 = vsel %vm151_vm2, %v5042_v40, 0.0 }
 0xc9f   :  { %1102 = vadd.xlane.f32.xlu0 %v1101_v41 }
 0xcb5   :  { %1106 = vrot.lane.b32.xlu0 %v5273_v25, %s5135_s27 }
 0xccd   :  { %v1006_v42 = vpop.f32.mrb[20].mxu1 }
 0xcce   :  { %v5457_v43 = vadd.f32 %v1006_v42, %v796_v10  ;;  %v4715_v3 = vpop.f32.mrb[21].mxu1 }
 0xccf   :  { %v1009_v44 = vpop.f32.mrb[22].mxu1 }
 0xcd0   :  { %v4716_v45 = vpop.f32.mrb[23].mxu1 }
 0xcd5   :  { %v1257_v46 = vpop.f32.mrb[24].mxu1 }
 0xcd6   :  { %v1258_v47 = vadd.f32 %v5319_v52, %v1257_v46  ;;  %v4731_v48 = vpop.f32.mrb[25].mxu1 }
 0xcd8   :  { %v1261_v49 = vadd.f32 %v1258_v47, %v5440_v24 }
 0xcda   :  { %v1262_v51 = vsel %vm151_vm2, %v1261_v49, -inf }
 0xcdb   :  { %1263 = vmax.xlane.f32.xlu1 %v1262_v51 }
 0xcec   :  { %1438 = vrot.lane.b32.xlu1 %v5273_v25, %s5140_s22 }
 0xd2c   :  { %v1103_v53 = vpop.xlane.xlu0 %1102 }
 0xd2d   :  { %5043 = vrcp.f32 %v1103_v53 }
 0xd30   :  { %v1107_v54 = vpop.permute.xlu0 %1106 }
 0xd31   :  { %4723 = vmatpush3.msra.mxu0 %v1107_v54 }
 0xd32   :  { %4732 = vmatprep.subr.mxu0 %v5133_v7 }
 0xd37   :  { %v5044_v56 = vpop.eup %5043 }
 0xd38   :  { %v1105_v57 = vmul.f32 %v5044_v56, %v5042_v40 }
 0xd3a   :  { %4725 = vmatmul.mubr.msk.f32.vlgmr.msra.gmra.mrb[14].mxu0 %vm151_vm2, %v1105_v57 }
 0xd3b   :  { %4734 = vmatprep.mubr.msk.f32.mxu0 %vm5134_vm1, %v5133_v7 }
 0xd68   :  { %v1264_v58 = vpop.xlane.xlu1 %1263 }
 0xd69   :  { %v1265_v59 = vsub.f32 %v1261_v49, %v1264_v58 }
 0xd6b   :  { %v1266_v60 = vmul.f32 1.442695, %v1265_v59 }
 0xd6c   :  { %v1439_v14 = vpop.permute.xlu1 %1438 }
 0xd6d   :  { %5045 = vpow2.f32 %v1266_v60 }
 0xd77   :  { %v5046_v61 = vpop.eup %5045 }
 0xd78   :  { %v1268_v62 = vsel %vm151_vm2, %v5046_v61, 0.0 }
 0xd79   :  { %1269 = vadd.xlane.f32.xlu0 %v1268_v62  ;;  %v5526_v62 = vadd.f32 %v5457_v43, %v5232_v0 }
 0xd8f   :  { %1273 = vrot.lane.b32.xlu0 %v5273_v25, %s5139_s21 }
 0xd93   :  { %1436 = vrot.lane.b32.xlu0 %v5273_v25, %s5141_s23 }
 0xe06   :  { %v1270_v63 = vpop.xlane.xlu0 %1269 }
 0xe07   :  { %5047 = vrcp.f32 %v1270_v63 }
 0xe0a   :  { %v1274_v2 = vpop.permute.xlu0 %1273 }
 0xe0b   :  { %4733 = vmatpush3.msra.mxu0 %v1274_v2 }
 0xe0c   :  { %4743 = vmatprep.subr.bf16.mxu0 %v5133_v7 }
 0xe0d   :  { %v1178_v4 = vpop.f32.mrb[14].mxu0 }
 0xe0e   :  { %v4726_v23 = vpop.f32.mrb[15].mxu0  ;;  %v1182_v10 = vpack.c.bf16 %v1178_v4, %v1178_v4  ;;  %v1437_v19 = vpop.permute.xlu0 %1436  ;;  %v1861_v4 = vmul.f32 %v5526_v62, %v5526_v62 }
 0xe11   :  { %v5048_v5 = vpop.eup %5047 }
 0xe12   :  { %v1272_v8 = vmul.f32 %v5048_v5, %v5046_v61 }
 0xe14   :  { %4735 = vmatmul.mubr.msk.f32.vlgmr.msra.gmra.mrb[16].mxu0 %vm151_vm2, %v1272_v8 }
 0xe15   :  { %4744 = vmatpush3.bf16.msra.mxu0 %v5348_v9  ;;  %4745 = vmatprep.mubr.msk.bf16.mxu0 %vm5134_vm1, %v5133_v7 }
 0xe16   :  { %4754 = vmatprep.subr.mxu0 %v5133_v7 }
 0xe18   :  { %4746 = vmatmul.mubr.msk.bf16.vlgmr.msra.gmra.mrb[20].mxu0 %vm151_vm2, %v1182_v10 }
 0xe19   :  { %4756 = vmatprep.mubr.msk.f32.mxu0 %vm5134_vm1, %v5133_v7 }
 0xee7   :  { %v1345_v11 = vpop.f32.mrb[16].mxu0 }
 0xee8   :  { %v1349_v12 = vpack.c.bf16 %v1345_v11, %v1345_v11  ;;  %v4736_v13 = vpop.f32.mrb[17].mxu0 }
 0xeea   :  { %4740 = vmatmul.mubr.msk.bf16.vlgmr.msra.gmra.mrb[28].mxu1 %vm151_vm2, %v1349_v12 }
 0xeeb   :  { %4750 = vmatpush3.xpose.msk.msra.mxu1 %vm151_vm2, %v1439_v14  ;;  %v1430_v9 = vpop.f32.mrb[20].mxu0  ;;  %4751 = vmatprep.mubr.msk.f32.mxu1 %vm5134_vm1, %v5133_v7 }
 0xeec   :  { %v4747_v15 = vpop.f32.mrb[21].mxu0  ;;  %4759 = vmatprep.subr.bf16.mxu1 %v5133_v7 }
 0xeed   :  { %v1433_v16 = vpop.f32.mrb[22].mxu0 }
 0xeee   :  { %v4748_v17 = vpop.f32.mrb[23].mxu0 }
 0xef2   :  { %4752 = vmatmul.mubr.msk.f32.vlgmr.msra.gmra.mrb[26].mxu1 %vm151_vm2, %v1437_v19 }
 0xef3   :  { %4760 = vmatpush3.bf16.msra.mxu1 %v5392_v50  ;;  %4761 = vmatprep.mubr.msk.bf16.mxu1 %vm5134_vm1, %v5133_v7 }
 0xef4   :  { %4775 = vmatprep.subr.bf16.mxu1 %v5133_v7 }
 0xfbd   :  { %v1387_v20 = vpop.f32.mrb[28].mxu1 }
 0xfbe   :  { %v5492_v21 = vadd.f32 %v1430_v9, %v1387_v20  ;;  %v4741_v22 = vpop.f32.mrb[29].mxu1 }
 0xfbf   :  { %v1390_v26 = vpop.f32.mrb[30].mxu1 }
 0xfc0   :  { %v4742_v27 = vpop.f32.mrb[31].mxu1 }
 0xfc1   :  { %v4985_v27 = vld [vmem:[%s5974_s7] sm:$0xff]  }
 0xfc5   :  { %v1510_v29 = vpop.f32.mrb[26].mxu1 }
 0xfc6   :  { %v1511_v35 = vadd.f32 %v5372_v28, %v1510_v29  ;;  %v4753_v36 = vpop.f32.mrb[27].mxu1  ;;  %v4986_v29 = vld [vmem:[%s5974_s7 + $0x8] sm:$0xff]  }
 0xfc8   :  { %v1514_v37 = vadd.f32 %v1511_v35, %v5440_v24  ;;  %v4988_v35 = vld [vmem:[%s5975_s8 + $0x8] sm:$0xff]  }
 0xfca   :  { %v1515_v32 = vsel %vm151_vm2, %v1514_v37, -inf }
 0xfcb   :  { %1516 = vmax.xlane.f32.xlu0 %v1515_v32 }
 0xfe1   :  { %1526 = vrot.lane.b32.xlu0 %v5273_v25, %s5142_s0 }
 0xfe5   :  { %1647 = vrot.lane.b32.xlu0 %v5273_v25, %s5144_s19 }
0x1058   :  { %v1517_v50 = vpop.xlane.xlu0 %1516 }
0x1059   :  { %v1518_v38 = vsub.f32 %v1514_v37, %v1517_v50 }
0x105b   :  { %v1519_v39 = vmul.f32 1.442695, %v1518_v38 }
0x105c   :  { %v1527_v40 = vpop.permute.xlu0 %1526 }
0x105d   :  { %5049 = vpow2.f32 %v1519_v39  ;;  %4755 = vmatpush3.msra.mxu0 %v1527_v40 }
0x105e   :  { %4765 = vmatprep.subr.mxu0 %v5133_v7 }
0x1060   :  { %v1648_v47 = vpop.permute.xlu0 %1647 }
0x1067   :  { %v5050_v41 = vpop.eup %5049 }
0x1068   :  { %v1521_v42 = vsel %vm151_vm2, %v5050_v41, 0.0 }
0x1069   :  { %1522 = vadd.xlane.f32.xlu1 %v1521_v42 }
0x107a   :  { %1649 = vrot.lane.b32.xlu1 %v5273_v25, %s5985_s24  ;;  %s5988_s24 = smov 40  }
0x10f6   :  { %v1523_v3 = vpop.xlane.xlu1 %1522 }
0x10f7   :  { %5051 = vrcp.f32 %v1523_v3  ;;  %v4402_v3 = vld [vmem:[%s5973_s6] ss:$0 sm:$0xff] }
0x10fa   :  { %v1650_v46 = vpop.permute.xlu1 %1649 }
0x1101   :  { %v5052_v44 = vpop.eup %5051 }
0x1102   :  { %v1525_v45 = vmul.f32 %v5052_v44, %v5050_v41 }
0x1104   :  { %4757 = vmatmul.mubr.msk.f32.vlgmr.msra.gmra.mrb[18].mxu0 %vm151_vm2, %v1525_v45 }
0x1105   :  { %4766 = vmatpush3.xpose.msk.msra.mxu0 %vm151_vm2, %v1650_v46  ;;  %4767 = vmatprep.mubr.msk.f32.mxu0 %vm5134_vm1, %v5133_v7 }
0x1106   :  { %4770 = vmatprep.subr.mxu0 %v5133_v7 }
0x1108   :  { %4768 = vmatmul.mubr.msk.f32.vlgmr.msra.gmra.mrb[24].mxu0 %vm151_vm2, %v1648_v47 }
0x1109   :  { %4772 = vmatprep.mubr.msk.f32.mxu0 %vm5134_vm1, %v5133_v7 }
0x11d7   :  { %v1598_v48 = vpop.f32.mrb[18].mxu0 }
0x11d8   :  { %v1602_v49 = vpack.c.bf16 %v1598_v48, %v1598_v48  ;;  %v4758_v51 = vpop.f32.mrb[19].mxu0  ;;  %v4989_v48 = vld [vmem:[%s5975_s8 + $0x10] sm:$0xff]  }
0x11da   :  { %4762 = vmatmul.mubr.msk.bf16.vlgmr.msra.gmra.mrb[32].mxu1 %vm151_vm2, %v1602_v49  ;;  %v4990_v49 = vld [vmem:[%s5975_s8 + $0x18] sm:$0xff]  }
0x11db   :  { %v1721_v53 = vpop.f32.mrb[24].mxu0  ;;  %4776 = vmatpush3.bf16.msra.mxu1 %v5421_v6  ;;  %4777 = vmatprep.mubr.msk.bf16.mxu1 %vm5134_vm1, %v5133_v7 }
0x11dc   :  { %v1722_v54 = vadd.f32 %v5399_v55, %v1721_v53  ;;  %v4769_v56 = vpop.f32.mrb[25].mxu0  ;;  %4789 = vmatprep.subr.bf16.mxu1 %v5133_v7 }
0x11de   :  { %v1725_v57 = vadd.f32 %v1722_v54, %v5440_v24 }
0x11e0   :  { %v1726_v58 = vsel %vm151_vm2, %v1725_v57, -inf }
0x11e1   :  { %1727 = vmax.xlane.f32.xlu0 %v1726_v58 }
0x11f7   :  { %1737 = vrot.lane.b32.xlu0 %v5273_v25, %s5983_s16  ;;  %v1863_v25 = vsel %vm58_vm0, %v1861_v4, 0.0 }
0x126e   :  { %v1728_v59 = vpop.xlane.xlu0 %1727 }
0x126f   :  { %v1729_v60 = vsub.f32 %v1725_v57, %v1728_v59 }
0x1271   :  { %v1730_v61 = vmul.f32 1.442695, %v1729_v60 }
0x1272   :  { %v1738_v6 = vpop.permute.xlu0 %1737 }
0x1273   :  { %5053 = vpow2.f32 %v1730_v61  ;;  %4771 = vmatpush3.msra.mxu0 %v1738_v6 }
0x1274   :  { %4781 = vmatprep.subr.bf16.mxu0 %v5133_v7 }
0x127d   :  { %v5054_v63 = vpop.eup %5053 }
0x127e   :  { %v1732_v2 = vsel %vm151_vm2, %v5054_v63, 0.0 }
0x127f   :  { %1733 = vadd.xlane.f32.xlu1 %v1732_v2 }
0x1283   :  { %1864 = vadd.xlane.f32.xlu1 %v1863_v25 }
0x12ad   :  { %v1640_v23 = vpop.f32.mrb[32].mxu1 }
0x12ae   :  { %v1646_v5 = vadd.f32 %v1640_v23, %v5492_v21  ;;  %v4763_v8 = vpop.f32.mrb[33].mxu1 }
0x12af   :  { %v1643_v10 = vpop.f32.mrb[34].mxu1 }
0x12b0   :  { %v4764_v11 = vpop.f32.mrb[35].mxu1  ;;  %v4992_v10 = vld [vmem:[%s5971_s4 + $0x18] sm:$0xff]  }
0x130c   :  { %v1734_v12 = vpop.xlane.xlu1 %1733 }
0x130d   :  { %5055 = vrcp.f32 %v1734_v12 }
0x1310   :  { %v1865_v36 = vpop.xlane.xlu1 %1864 }
0x1311   :  { %v1869_v37 = vmul.f32 0.03125, %v1865_v36 }
0x1313   :  { %v1871_v32 = vadd.f32 1e-06, %v1869_v37 }
0x1315   :  { %5057 = vrsqrt.f32 %v1871_v32 }
0x1317   :  { %v5056_v0 = vpop.eup %5055 }
0x1318   :  { %v1736_v43 = vmul.f32 %v5056_v0, %v5054_v63 }
0x131a   :  { %4773 = vmatmul.mubr.msk.f32.vlgmr.msra.gmra.mrb[26].mxu0 %vm151_vm2, %v1736_v43 }
0x131b   :  { %4785 = vmatprep.mubr.msk.bf16.mxu0 %vm5134_vm1, %v5133_v7  ;;  %4782 = vmatpush3.bf16.msra.mxu0 %v4985_v27 }
0x131c   :  { %4783 = vmatprep.subr.bf16.mxu0 %v5133_v7 }
0x131f   :  { %4784 = vmatpush3.bf16.msra.mxu0 %v4986_v29  ;;  %v5058_v40 = vpop.eup %5057 }
0x1320   :  { %4801 = vmatprep.subr.bf16.mxu0 %v5133_v7  ;;  %v1875_v41 = vmul.f32 %v5058_v40, %v5526_v62 }
0x1322   :  { %v1883_v45 = vmul.f32 %v4402_v3, %v1875_v41 }
0x13ed   :  { %v1809_v13 = vpop.f32.mrb[26].mxu0 }
0x13ee   :  { %v1813_v14 = vpack.c.bf16 %v1809_v13, %v1809_v13  ;;  %v4774_v9 = vpop.f32.mrb[27].mxu0 }
0x13f0   :  { %4778 = vmatmul.mubr.msk.bf16.vlgmr.msra.gmra.mrb[36].mxu1 %vm151_vm2, %v1813_v14 }
0x13f1   :  { %4797 = vmatprep.mubr.msk.bf16.mxu1 %vm5134_vm1, %v5133_v7 }
0x14c3   :  { %v1851_v15 = vpop.f32.mrb[36].mxu1 }
0x14c4   :  { %v1857_v16 = vadd.f32 %v1851_v15, %v1646_v5  ;;  %v4779_v17 = vpop.f32.mrb[37].mxu1 }
0x14c5   :  { %v1854_v19 = vpop.f32.mrb[38].mxu1  ;;  %v4412_v17 = vld [vmem:[%s5970_s3 + $0x1] ss:$0 sm:$0xff] }
0x14c6   :  { %v1859_v20 = vadd.f32 %v1857_v16, %v5237_v1  ;;  %v4780_v21 = vpop.f32.mrb[39].mxu1  ;;  %v4987_v1 = vld [vmem:[%s5975_s8] sm:$0xff]  }
0x14c7   :  { %4790 = vmatpush3.bf16.msra.mxu1 %v4987_v1 }
0x14c8   :  { %v1862_v22 = vmul.f32 %v1859_v20, %v1859_v20  ;;  %4791 = vmatprep.subr.bf16.mxu1 %v5133_v7 }
0x14ca   :  { %v1866_v26 = vsel %vm58_vm0, %v1862_v22, 0.0 }
0x14cb   :  { %1867 = vadd.xlane.f32.xlu1 %v1866_v26  ;;  %4792 = vmatpush3.bf16.msra.mxu1 %v4988_v35 }
0x14cc   :  { %4793 = vmatprep.subr.bf16.mxu1 %v5133_v7 }
0x14cf   :  { %4794 = vmatpush3.bf16.msra.mxu1 %v4989_v48 }
0x14d0   :  { %4795 = vmatprep.subr.bf16.mxu1 %v5133_v7 }
0x14d3   :  { %4796 = vmatpush3.bf16.msra.mxu1 %v4990_v49 }
0x14d4   :  { %4814 = vmatprep.subr.mxu1 %v5133_v7 }
0x1558   :  { %v1868_v50 = vpop.xlane.xlu1 %1867 }
0x1559   :  { %v1870_v38 = vmul.f32 0.03125, %v1868_v50 }
0x155b   :  { %v1872_v39 = vadd.f32 1e-06, %v1870_v38 }
0x155d   :  { %5059 = vrsqrt.f32 %v1872_v39 }
0x1567   :  { %v5060_v42 = vpop.eup %5059 }
0x1568   :  { %v1876_v44 = vmul.f32 %v5060_v42, %v1859_v20 }
0x156a   :  { %v1884_v46 = vmul.f32 %v4402_v3, %v1876_v44 }
0x156c   :  { %v1885_v47 = vpack.c.bf16 %v1884_v46, %v1883_v45 }
0x156e   :  { %4786 = vmatmul.mubr.msk.bf16.vlgmr.msra.gmra.mrb[28].mxu0 %vm58_vm0, %v1885_v47 }
0x156f   :  { %4805 = vmatprep.mubr.msk.bf16.mxu0 %vm5134_vm1, %v5133_v7 }
0x1641   :  { %v1939_v51 = vpop.f32.mrb[28].mxu0 }
0x1642   :  { %v4787_v53 = vpop.f32.mrb[29].mxu0  ;;  %v1946_v56 = vmax.f32 %v1939_v51, 0.0 }
0x1643   :  { %v1942_v54 = vpop.f32.mrb[30].mxu0 }
0x1644   :  { %v1947_v57 = vmax.f32 %v1942_v54, 0.0  ;;  %v4788_v58 = vpop.f32.mrb[31].mxu0 }
0x1646   :  { %v1948_v59 = vpack.c.bf16 %v1947_v57, %v1946_v56  ;;  %v4421_v57 = vld [vmem:[%s5972_s5 + $0x14] sm:$0xf] }
0x1647   :  { %v5641_v58 = vsel %vm491_vm3, %v4421_v57, 0 }
0x1648   :  { %4798 = vmatmul.mubr.msk.bf16.vlgmr.msra.gmra.mrb[40].mxu1 %vm1981_vm4, %v1948_v59 }
0x1649   :  { %4816 = vmatprep.mubr.msk.f32.mxu1 %vm5134_vm1, %v5133_v7 }
0x171b   :  { %v2019_v60 = vpop.f32.mrb[40].mxu1 }
0x171c   :  { %v5576_v61 = vadd.f32 %v2019_v60, %v5526_v62  ;;  %v4799_v6 = vpop.f32.mrb[41].mxu1  ;;  %v4991_v62 = vld [vmem:[%s5971_s4 + $0x10] sm:$0xff]  }
0x171d   :  { %v2022_v63 = vpop.f32.mrb[42].mxu1  ;;  %4802 = vmatpush3.bf16.msra.mxu0 %v4991_v62 }
0x171e   :  { %v5578_v2 = vadd.f32 %v2022_v63, %v1859_v20  ;;  %v4800_v4 = vpop.f32.mrb[43].mxu1  ;;  %v2030_v25 = vmul.f32 %v5576_v61, %v5576_v61  ;;  %4803 = vmatprep.subr.bf16.mxu0 %v5133_v7 }
0x1720   :  { %v2032_v23 = vsel %vm58_vm0, %v2030_v25, 0.0  ;;  %v2031_v5 = vmul.f32 %v5578_v2, %v5578_v2 }
0x1721   :  { %2033 = vadd.xlane.f32.xlu1 %v2032_v23  ;;  %4804 = vmatpush3.bf16.msra.mxu0 %v4992_v10 }
0x1722   :  { %v2035_v8 = vsel %vm58_vm0, %v2031_v5, 0.0  ;;  %4809 = vmatprep.subr.mxu0 %v5133_v7 }
0x1723   :  { %2036 = vadd.xlane.f32.xlu0 %v2035_v8  ;;  %v4420_v8 = vld [vmem:[%s5972_s5 + $0x10] sm:$0xf] }
0x1724   :  { %v5659_v62 = vsel %vm491_vm3, %v4420_v8, 0 }
0x17ae   :  { %v2034_v11 = vpop.xlane.xlu1 %2033 }
0x17af   :  { %v2038_v12 = vmul.f32 0.03125, %v2034_v11 }
0x17b0   :  { %v2037_v0 = vpop.xlane.xlu0 %2036 }
0x17b1   :  { %v2040_v43 = vadd.f32 1e-06, %v2038_v12  ;;  %v2039_v13 = vmul.f32 0.03125, %v2037_v0 }
0x17b3   :  { %5061 = vrsqrt.f32 %v2040_v43  ;;  %v2041_v14 = vadd.f32 1e-06, %v2039_v13 }
0x17b5   :  { %5063 = vrsqrt.f32 %v2041_v14 }
0x17bd   :  { %v5062_v9 = vpop.eup %5061 }
0x17be   :  { %v2044_v15 = vmul.f32 %v5062_v9, %v5576_v61 }
0x17bf   :  { %v5064_v16 = vpop.eup %5063 }
0x17c0   :  { %v2045_v19 = vmul.f32 %v5064_v16, %v5578_v2  ;;  %v2052_v20 = vmul.f32 %v4412_v17, %v2044_v15 }
0x17c2   :  { %v2053_v21 = vmul.f32 %v4412_v17, %v2045_v19 }
0x17c4   :  { %v2054_v22 = vpack.c.bf16 %v2053_v21, %v2052_v20 }
0x17c6   :  { %4806 = vmatmul.mubr.msk.bf16.vlgmr.msra.gmra.mrb[32].mxu0 %vm58_vm0, %v2054_v22 }
0x17c7   :  { %4811 = vmatprep.mubr.msk.f32.mxu0 %vm5134_vm1, %v5133_v7 }
0x1899   :  { %v5602_v26 = vpop.f32.mrb[32].mxu0 }
0x189a   :  { %2122 = vrot.lane.b32.xlu1 %v5602_v26, %s5136_s28  ;;  %v4807_v27 = vpop.f32.mrb[33].mxu0 }
0x189b   :  { %v5606_v29 = vpop.f32.mrb[34].mxu0 }
0x189c   :  { %v4808_v1 = vpop.f32.mrb[35].mxu0 }
0x189e   :  { %2289 = vrot.lane.b32.xlu1 %v5602_v26, %s5137_s29 }
0x18a2   :  { %2287 = vrot.lane.b32.xlu1 %v5602_v26, %s5138_s2 }
0x190c   :  { %v2123_v35 = vpop.permute.xlu1 %2122 }
0x190d   :  { %4810 = vmatpush3.xpose.msk.msra.mxu0 %vm151_vm2, %v2123_v35 }
0x190e   :  { %4819 = vmatprep.subr.mxu0 %v5133_v7 }
0x1910   :  { %4812 = vmatmul.mubr.msk.f32.vlgmr.msra.gmra.mrb[36].mxu0 %vm151_vm2, %v5602_v26  ;;  %v2290_v36 = vpop.permute.xlu1 %2289 }
0x1911   :  { %4820 = vmatpush3.xpose.msk.msra.mxu0 %vm151_vm2, %v2290_v36  ;;  %4821 = vmatprep.mubr.msk.f32.mxu0 %vm5134_vm1, %v5133_v7 }
0x1912   :  { %4829 = vmatprep.subr.bf16.mxu0 %v5133_v7 }
0x1914   :  { %v2288_v37 = vpop.permute.xlu1 %2287 }
0x1915   :  { %4822 = vmatmul.mubr.msk.f32.vlgmr.msra.gmra.mrb[38].mxu0 %vm151_vm2, %v2288_v37 }
0x1916   :  { %4831 = vmatprep.mubr.msk.bf16.mxu0 %vm5134_vm1, %v5133_v7  ;;  %4830 = vmatpush3.bf16.msra.mxu0 %v5641_v58 }
0x1917   :  { %4841 = vmatprep.subr.mxu0 %v5133_v7 }
0x19e3   :  { %v2194_v32 = vpop.f32.mrb[36].mxu0 }
0x19e4   :  { %v2195_v50 = vadd.f32 %v2194_v32, %v5295_v33  ;;  %v4813_v38 = vpop.f32.mrb[37].mxu0 }
0x19e6   :  { %v2198_v39 = vadd.f32 %v2195_v50, %v5300_v34 }
0x19e8   :  { %v2361_v40 = vpop.f32.mrb[38].mxu0  ;;  %v2199_v41 = vsel %vm151_vm2, %v2198_v39, -inf }
0x19e9   :  { %v2362_v42 = vadd.f32 %v5319_v52, %v2361_v40  ;;  %2200 = vmax.xlane.f32.xlu1 %v2199_v41  ;;  %v4823_v3 = vpop.f32.mrb[39].mxu0 }
0x19eb   :  { %v2365_v44 = vadd.f32 %v2362_v42, %v5300_v34 }
0x19ed   :  { %v2366_v45 = vsel %vm151_vm2, %v2365_v44, -inf }
0x19ee   :  { %2367 = vmax.xlane.f32.xlu0 %v2366_v45 }
0x19fa   :  { %2377 = vrot.lane.b32.xlu1 %v5602_v26, %s5139_s21 }
0x1a76   :  { %v2201_v46 = vpop.xlane.xlu1 %2200 }
0x1a77   :  { %v2202_v33 = vsub.f32 %v2198_v39, %v2201_v46 }
0x1a79   :  { %v2203_v47 = vmul.f32 1.442695, %v2202_v33 }
0x1a7a   :  { %v2378_v25 = vpop.permute.xlu1 %2377 }
0x1a7b   :  { %5065 = vpow2.f32 %v2203_v47  ;;  %v2368_v48 = vpop.xlane.xlu0 %2367  ;;  %v4422_v47 = vld [vmem:[%s5972_s5 + $0x18] sm:$0xf] }
0x1a7c   :  { %v2369_v49 = vsub.f32 %v2365_v44, %v2368_v48  ;;  %v5699_v48 = vsel %vm491_vm3, %v4422_v47, 0 }
0x1a7e   :  { %v2370_v51 = vmul.f32 1.442695, %v2369_v49 }
0x1a80   :  { %5067 = vpow2.f32 %v2370_v51 }
0x1a85   :  { %v5066_v53 = vpop.eup %5065 }
0x1a86   :  { %v2205_v52 = vsel %vm151_vm2, %v5066_v53, 0.0 }
0x1a87   :  { %2206 = vadd.xlane.f32.xlu0 %v2205_v52 }
0x1a8a   :  { %v5068_v54 = vpop.eup %5067 }
0x1a8b   :  { %v2372_v56 = vsel %vm151_vm2, %v5068_v54, 0.0 }
0x1a8c   :  { %2373 = vadd.xlane.f32.xlu0 %v2372_v56 }
0x1aa2   :  { %2210 = vrot.lane.b32.xlu0 %v5602_v26, %s5135_s27 }
0x1aa6   :  { %2548 = vrot.lane.b32.xlu0 %v5602_v26, %s5140_s22 }
0x1aaa   :  { %2546 = vrot.lane.b32.xlu0 %v5602_v26, %s5141_s23 }
0x1b14   :  { %v2207_v59 = vpop.xlane.xlu0 %2206 }
0x1b15   :  { %5069 = vrcp.f32 %v2207_v59 }
0x1b19   :  { %v2374_v60 = vpop.xlane.xlu0 %2373 }
0x1b1a   :  { %5071 = vrcp.f32 %v2374_v60 }
0x1b1d   :  { %v2211_v6 = vpop.permute.xlu0 %2210 }
0x1b1e   :  { %4815 = vmatpush3.msra.mxu1 %v2211_v6 }
0x1b1f   :  { %v5070_v63 = vpop.eup %5069  ;;  %4824 = vmatprep.subr.mxu1 %v5133_v7 }
0x1b20   :  { %v2209_v4 = vmul.f32 %v5070_v63, %v5066_v53 }
0x1b21   :  { %v2549_v14 = vpop.permute.xlu0 %2548 }
0x1b22   :  { %4817 = vmatmul.mubr.msk.f32.vlgmr.msra.gmra.mrb[44].mxu1 %vm151_vm2, %v2209_v4 }
0x1b23   :  { %4825 = vmatpush3.msra.mxu1 %v2378_v25  ;;  %4826 = vmatprep.mubr.msk.f32.mxu1 %vm5134_vm1, %v5133_v7 }
0x1b24   :  { %v5072_v23 = vpop.eup %5071  ;;  %4835 = vmatprep.subr.bf16.mxu1 %v5133_v7 }
0x1b25   :  { %v2376_v5 = vmul.f32 %v5072_v23, %v5068_v54  ;;  %v2547_v9 = vpop.permute.xlu0 %2546 }
0x1b27   :  { %4827 = vmatmul.mubr.msk.f32.vlgmr.msra.gmra.mrb[46].mxu1 %vm151_vm2, %v2376_v5 }
0x1b28   :  { %4837 = vmatprep.mubr.msk.bf16.mxu1 %vm5134_vm1, %v5133_v7  ;;  %4836 = vmatpush3.bf16.msra.mxu1 %v5659_v62 }
0x1b29   :  { %4846 = vmatprep.subr.mxu1 %v5133_v7 }
0x1bf5   :  { %v2282_v10 = vpop.f32.mrb[44].mxu1 }
0x1bf6   :  { %v2286_v11 = vpack.c.bf16 %v2282_v10, %v2282_v10  ;;  %v4818_v12 = vpop.f32.mrb[45].mxu1 }
0x1bf8   :  { %4838 = vmatmul.mubr.msk.bf16.vlgmr.msra.gmra.mrb[48].mxu1 %vm151_vm2, %v2286_v11 }
0x1bf9   :  { %4848 = vmatprep.mubr.msk.f32.mxu1 %vm5134_vm1, %v5133_v7 }
0x1bfa   :  { %v2449_v0 = vpop.f32.mrb[46].mxu1 }
0x1bfb   :  { %v2453_v43 = vpack.c.bf16 %v2449_v0, %v2449_v0  ;;  %v4828_v13 = vpop.f32.mrb[47].mxu1 }
0x1bfd   :  { %4832 = vmatmul.mubr.msk.bf16.vlgmr.msra.gmra.mrb[40].mxu0 %vm151_vm2, %v2453_v43 }
0x1bfe   :  { %4842 = vmatpush3.xpose.msk.msra.mxu0 %vm151_vm2, %v2549_v14  ;;  %4843 = vmatprep.mubr.msk.f32.mxu0 %vm5134_vm1, %v5133_v7 }
0x1bff   :  { %4851 = vmatprep.subr.bf16.mxu0 %v5133_v7 }
0x1c05   :  { %4844 = vmatmul.mubr.msk.f32.vlgmr.msra.gmra.mrb[44].mxu0 %vm151_vm2, %v2547_v9 }
0x1c06   :  { %4853 = vmatprep.mubr.msk.bf16.mxu0 %vm5134_vm1, %v5133_v7  ;;  %4852 = vmatpush3.bf16.msra.mxu0 %v5699_v48 }
0x1c07   :  { %4867 = vmatprep.subr.bf16.mxu0 %v5133_v7 }
0x1ccb   :  { %v2540_v15 = vpop.f32.mrb[48].mxu1 }
0x1ccc   :  { %v4839_v16 = vpop.f32.mrb[49].mxu1 }
0x1ccd   :  { %v2543_v17 = vpop.f32.mrb[50].mxu1 }
0x1cce   :  { %v4840_v19 = vpop.f32.mrb[51].mxu1 }
0x1ccf   :  { %v5105_v19 = vld [vmem:[%s5968_s1] sm:$0xff] }
0x1cd0   :  { %v2494_v20 = vpop.f32.mrb[40].mxu0 }
0x1cd1   :  { %v5674_v21 = vadd.f32 %v2540_v15, %v2494_v20  ;;  %v4833_v22 = vpop.f32.mrb[41].mxu0 }
0x1cd2   :  { %v2497_v27 = vpop.f32.mrb[42].mxu0 }
0x1cd3   :  { %v4834_v1 = vpop.f32.mrb[43].mxu0 }
0x1cd8   :  { %v2620_v35 = vpop.f32.mrb[44].mxu0 }
0x1cd9   :  { %v2621_v36 = vadd.f32 %v5372_v28, %v2620_v35  ;;  %v4845_v37 = vpop.f32.mrb[45].mxu0 }
0x1cdb   :  { %v2624_v32 = vadd.f32 %v2621_v36, %v5300_v34 }
0x1cdd   :  { %v2625_v50 = vsel %vm151_vm2, %v2624_v32, -inf }
0x1cde   :  { %2626 = vmax.xlane.f32.xlu0 %v2625_v50 }
0x1cf4   :  { %2636 = vrot.lane.b32.xlu0 %v5602_v26, %s5142_s0 }
0x1cf8   :  { %2760 = vrot.lane.b32.xlu0 %v5602_v26, %s5144_s19 }
0x1d6b   :  { %v2627_v38 = vpop.xlane.xlu0 %2626 }
0x1d6c   :  { %v2628_v39 = vsub.f32 %v2624_v32, %v2627_v38 }
0x1d6e   :  { %v2629_v40 = vmul.f32 1.442695, %v2628_v39 }
0x1d6f   :  { %v2637_v41 = vpop.permute.xlu0 %2636 }
0x1d70   :  { %5073 = vpow2.f32 %v2629_v40  ;;  %4847 = vmatpush3.msra.mxu1 %v2637_v41 }
0x1d71   :  { %4857 = vmatprep.subr.mxu1 %v5133_v7 }
0x1d73   :  { %v2761_v33 = vpop.permute.xlu0 %2760 }
0x1d7a   :  { %v5074_v28 = vpop.eup %5073 }
0x1d7b   :  { %v2631_v42 = vsel %vm151_vm2, %v5074_v28, 0.0 }
0x1d7c   :  { %2632 = vadd.xlane.f32.xlu1 %v2631_v42  ;;  %v5106_v42 = vld [vmem:[%s5968_s1 + $0x8] sm:$0xff] }
0x1d8d   :  { %2762 = vrot.lane.b32.xlu1 %v5602_v26, %s5987_s17 }
0x1e09   :  { %v2633_v3 = vpop.xlane.xlu1 %2632 }
0x1e0a   :  { %5075 = vrcp.f32 %v2633_v3 }
0x1e0d   :  { %v2763_v46 = vpop.permute.xlu1 %2762 }
0x1e14   :  { %v5076_v44 = vpop.eup %5075 }
0x1e15   :  { %v2635_v45 = vmul.f32 %v5076_v44, %v5074_v28 }
0x1e17   :  { %4849 = vmatmul.mubr.msk.f32.vlgmr.msra.gmra.mrb[52].mxu1 %vm151_vm2, %v2635_v45 }
0x1e18   :  { %4858 = vmatpush3.xpose.msk.msra.mxu1 %vm151_vm2, %v2763_v46  ;;  %4859 = vmatprep.mubr.msk.f32.mxu1 %vm5134_vm1, %v5133_v7 }
0x1e19   :  { %4862 = vmatprep.subr.mxu1 %v5133_v7 }
0x1e1b   :  { %4860 = vmatmul.mubr.msk.f32.vlgmr.msra.gmra.mrb[54].mxu1 %vm151_vm2, %v2761_v33 }
0x1e1c   :  { %4864 = vmatprep.mubr.msk.f32.mxu1 %vm5134_vm1, %v5133_v7 }
0x1eea   :  { %v2708_v49 = vpop.f32.mrb[52].mxu1 }
0x1eeb   :  { %v2712_v51 = vpack.c.bf16 %v2708_v49, %v2708_v49  ;;  %v4850_v53 = vpop.f32.mrb[53].mxu1 }
0x1eed   :  { %4854 = vmatmul.mubr.msk.bf16.vlgmr.msra.gmra.mrb[48].mxu0 %vm151_vm2, %v2712_v51 }
0x1eee   :  { %v2834_v52 = vpop.f32.mrb[54].mxu1  ;;  %4869 = vmatprep.mubr.msk.bf16.mxu0 %vm5134_vm1, %v5133_v7 }
0x1eef   :  { %v2835_v54 = vadd.f32 %v5399_v55, %v2834_v52  ;;  %v4861_v56 = vpop.f32.mrb[55].mxu1 }
0x1ef1   :  { %v2838_v57 = vadd.f32 %v2835_v54, %v5300_v34 }
0x1ef3   :  { %v2839_v59 = vsel %vm151_vm2, %v2838_v57, -inf }
0x1ef4   :  { %2840 = vmax.xlane.f32.xlu0 %v2839_v59 }
0x1f0a   :  { %2850 = vrot.lane.b32.xlu0 %v5602_v26, %s5988_s24  ;;  %v4423_v26 = vld [vmem:[%s5972_s5 + $0x1c] sm:$0xf] }
0x1f0b   :  { %v5723_v25 = vsel %vm491_vm3, %v4423_v26, 0 }
0x1f0c   :  { %4868 = vmatpush3.bf16.msra.mxu0 %v5723_v25 }
0x1f0d   :  { %4883 = vmatprep.subr.mxu0 %v5133_v7 }
0x1f0e   :  { %3142 = vrot.lane.b32.xlu0 %v5606_v29, %s5137_s29 }
0x1f81   :  { %v2841_v60 = vpop.xlane.xlu0 %2840 }
0x1f82   :  { %v2842_v6 = vsub.f32 %v2838_v57, %v2841_v60 }
0x1f84   :  { %v2843_v63 = vmul.f32 1.442695, %v2842_v6 }
0x1f85   :  { %v2851_v4 = vpop.permute.xlu0 %2850 }
0x1f86   :  { %5077 = vpow2.f32 %v2843_v63  ;;  %4863 = vmatpush3.msra.mxu1 %v2851_v4 }
0x1f87   :  { %4873 = vmatprep.subr.mxu1 %v5133_v7 }
0x1f89   :  { %v3143_v16 = vpop.permute.xlu0 %3142 }
0x1f90   :  { %v5078_v55 = vpop.eup %5077 }
0x1f91   :  { %v2845_v34 = vsel %vm151_vm2, %v5078_v55, 0.0 }
0x1f92   :  { %2846 = vadd.xlane.f32.xlu1 %v2845_v34 }
0x1fa3   :  { %2975 = vrot.lane.b32.xlu1 %v5606_v29, %s5136_s28 }
0x1fa7   :  { %3140 = vrot.lane.b32.xlu1 %v5606_v29, %s5138_s2 }
0x1fc0   :  { %v2753_v23 = vpop.f32.mrb[48].mxu0 }
0x1fc1   :  { %v2759_v5 = vadd.f32 %v2753_v23, %v5674_v21  ;;  %v4855_v8 = vpop.f32.mrb[49].mxu0 }
0x1fc2   :  { %v2756_v10 = vpop.f32.mrb[50].mxu0 }
0x1fc3   :  { %v4856_v11 = vpop.f32.mrb[51].mxu0 }
0x201f   :  { %v2847_v12 = vpop.xlane.xlu1 %2846 }
0x2020   :  { %5079 = vrcp.f32 %v2847_v12 }
0x2023   :  { %v2976_v13 = vpop.permute.xlu1 %2975 }
0x2027   :  { %v3141_v1 = vpop.permute.xlu1 %3140 }
0x202a   :  { %v5080_v0 = vpop.eup %5079 }
0x202b   :  { %v2849_v43 = vmul.f32 %v5080_v0, %v5078_v55 }
0x202d   :  { %4865 = vmatmul.mubr.msk.f32.vlgmr.msra.gmra.mrb[56].mxu1 %vm151_vm2, %v2849_v43 }
0x202e   :  { %4874 = vmatpush3.xpose.msk.msra.mxu1 %vm151_vm2, %v2976_v13  ;;  %4875 = vmatprep.mubr.msk.f32.mxu1 %vm5134_vm1, %v5133_v7 }
0x202f   :  { %4878 = vmatprep.subr.mxu1 %v5133_v7 }
0x2031   :  { %4876 = vmatmul.mubr.msk.f32.vlgmr.msra.gmra.mrb[58].mxu1 %vm151_vm2, %v5606_v29 }
0x2032   :  { %4880 = vmatprep.mubr.msk.f32.mxu1 %vm5134_vm1, %v5133_v7 }
0x2100   :  { %v2922_v14 = vpop.f32.mrb[56].mxu1 }
0x2101   :  { %v2926_v9 = vpack.c.bf16 %v2922_v14, %v2922_v14  ;;  %v4866_v15 = vpop.f32.mrb[57].mxu1 }
0x2103   :  { %4870 = vmatmul.mubr.msk.bf16.vlgmr.msra.gmra.mrb[52].mxu0 %vm151_vm2, %v2926_v9 }
0x2104   :  { %4884 = vmatpush3.xpose.msk.msra.mxu0 %vm151_vm2, %v3143_v16  ;;  %v3047_v17 = vpop.f32.mrb[58].mxu1  ;;  %4885 = vmatprep.mubr.msk.f32.mxu0 %vm5134_vm1, %v5133_v7 }
0x2105   :  { %v3048_v20 = vadd.f32 %v5105_v19, %v3047_v17  ;;  %v4877_v21 = vpop.f32.mrb[59].mxu1  ;;  %4893 = vmatprep.subr.bf16.mxu0 %v5133_v7 }
0x2107   :  { %v3051_v22 = vadd.f32 %v3048_v20, %v5440_v24 }
0x2109   :  { %v3052_v27 = vsel %vm151_vm2, %v3051_v22, -inf }
0x210a   :  { %3053 = vmax.xlane.f32.xlu0 %v3052_v27 }
0x210b   :  { %4886 = vmatmul.mubr.msk.f32.vlgmr.msra.gmra.mrb[46].mxu0 %vm151_vm2, %v3141_v1 }
0x210c   :  { %4894 = vmatpush3.bf16.msra.mxu0 %v5641_v58  ;;  %4895 = vmatprep.mubr.msk.bf16.mxu0 %vm5134_vm1, %v5133_v7 }
0x210d   :  { %4905 = vmatprep.subr.mxu0 %v5133_v7 }
0x2197   :  { %v3054_v35 = vpop.xlane.xlu0 %3053 }
0x2198   :  { %v3055_v36 = vsub.f32 %v3051_v22, %v3054_v35 }
0x219a   :  { %v3056_v37 = vmul.f32 1.442695, %v3055_v36 }
0x219c   :  { %5081 = vpow2.f32 %v3056_v37 }
0x21a6   :  { %v5082_v32 = vpop.eup %5081 }
0x21a7   :  { %v3058_v50 = vsel %vm151_vm2, %v5082_v32, 0.0 }
0x21a8   :  { %3059 = vadd.xlane.f32.xlu0 %v3058_v50 }
0x21d6   :  { %v2967_v38 = vpop.f32.mrb[52].mxu0 }
0x21d7   :  { %v5753_v39 = vadd.f32 %v2967_v38, %v2759_v5  ;;  %v4871_v40 = vpop.f32.mrb[53].mxu0 }
0x21d8   :  { %v2970_v41 = vpop.f32.mrb[54].mxu0 }
0x21d9   :  { %v4872_v28 = vpop.f32.mrb[55].mxu0 }
0x21de   :  { %v3214_v58 = vpop.f32.mrb[46].mxu0 }
0x21df   :  { %v3215_v3 = vadd.f32 %v5106_v42, %v3214_v58  ;;  %v4887_v44 = vpop.f32.mrb[47].mxu0 }
0x21e0   :  { %v5821_v44 = vadd.f32 %v5753_v39, %v5576_v61 }
0x21e1   :  { %v3218_v45 = vadd.f32 %v3215_v3, %v5440_v24 }
0x21e3   :  { %v3219_v46 = vsel %vm151_vm2, %v3218_v45, -inf }
0x21e4   :  { %3220 = vmax.xlane.f32.xlu1 %v3219_v46 }
0x21f5   :  { %3230 = vrot.lane.b32.xlu1 %v5606_v29, %s5139_s21 }
0x21f9   :  { %3395 = vrot.lane.b32.xlu1 %v5606_v29, %s5140_s22 }
0x21fd   :  { %3393 = vrot.lane.b32.xlu1 %v5606_v29, %s5141_s23 }
0x2235   :  { %v3060_v52 = vpop.xlane.xlu0 %3059 }
0x2271   :  { %v3221_v33 = vpop.xlane.xlu1 %3220 }
0x2272   :  { %v3222_v47 = vsub.f32 %v3218_v45, %v3221_v33  ;;  %v5108_v45 = vld [vmem:[%s5968_s1 + $0x18] sm:$0xff] }
0x2274   :  { %v3223_v49 = vmul.f32 1.442695, %v3222_v47 }
0x2275   :  { %v3231_v60 = vpop.permute.xlu1 %3230 }
0x2276   :  { %5083 = vpow2.f32 %v3223_v49 }
0x2277   :  { %5085 = vrcp.f32 %v3060_v52 }
0x2279   :  { %v3396_v8 = vpop.permute.xlu1 %3395 }
0x2280   :  { %v5084_v51 = vpop.eup %5083 }
0x2281   :  { %v3225_v53 = vsel %vm151_vm2, %v5084_v51, 0.0  ;;  %v5086_v56 = vpop.eup %5085 }
0x2282   :  { %3226 = vadd.xlane.f32.xlu0 %v3225_v53  ;;  %v3062_v57 = vmul.f32 %v5086_v56, %v5082_v32 }
0x2298   :  { %3063 = vrot.lane.b32.xlu0 %v5606_v29, %s5135_s27 }
0x230f   :  { %v3227_v54 = vpop.xlane.xlu0 %3226 }
0x2310   :  { %5087 = vrcp.f32 %v3227_v54 }
0x2313   :  { %v3064_v59 = vpop.permute.xlu0 %3063 }
0x2314   :  { %4879 = vmatpush3.msra.mxu1 %v3064_v59 }
0x2315   :  { %4881 = vmatmul.mubr.msk.f32.vlgmr.msra.gmra.mrb[60].mxu1 %vm151_vm2, %v3062_v57  ;;  %4888 = vmatprep.subr.mxu1 %v5133_v7 }
0x2316   :  { %4889 = vmatpush3.msra.mxu1 %v3231_v60  ;;  %4890 = vmatprep.mubr.msk.f32.mxu1 %vm5134_vm1, %v5133_v7 }
0x2317   :  { %4899 = vmatprep.subr.bf16.mxu1 %v5133_v7 }
0x231a   :  { %v5088_v6 = vpop.eup %5087 }
0x231b   :  { %v3229_v63 = vmul.f32 %v5088_v6, %v5084_v51 }
0x231d   :  { %4891 = vmatmul.mubr.msk.f32.vlgmr.msra.gmra.mrb[62].mxu1 %vm151_vm2, %v3229_v63 }
0x231e   :  { %4900 = vmatpush3.bf16.msra.mxu1 %v5659_v62  ;;  %4901 = vmatprep.mubr.msk.bf16.mxu1 %vm5134_vm1, %v5133_v7  ;;  %v3394_v62 = vpop.permute.xlu1 %3393 }
0x231f   :  { %4910 = vmatprep.subr.mxu1 %v5133_v7 }
0x23e8   :  { %v3135_v4 = vpop.f32.mrb[60].mxu1 }
0x23e9   :  { %v3139_v55 = vpack.c.bf16 %v3135_v4, %v3135_v4  ;;  %v4882_v34 = vpop.f32.mrb[61].mxu1 }
0x23eb   :  { %4902 = vmatmul.mubr.msk.bf16.vlgmr.msra.gmra.mrb[64].mxu1 %vm151_vm2, %v3139_v55 }
0x23ec   :  { %4912 = vmatprep.mubr.msk.f32.mxu1 %vm5134_vm1, %v5133_v7 }
0x23f0   :  { %v3302_v26 = vpop.f32.mrb[62].mxu1 }
0x23f1   :  { %v3306_v23 = vpack.c.bf16 %v3302_v26, %v3302_v26  ;;  %v4892_v5 = vpop.f32.mrb[63].mxu1 }
0x23f3   :  { %4896 = vmatmul.mubr.msk.bf16.vlgmr.msra.gmra.mrb[56].mxu0 %vm151_vm2, %v3306_v23 }
0x23f4   :  { %4906 = vmatpush3.xpose.msk.msra.mxu0 %vm151_vm2, %v3396_v8  ;;  %4907 = vmatprep.mubr.msk.f32.mxu0 %vm5134_vm1, %v5133_v7 }
0x23f5   :  { %4915 = vmatprep.subr.bf16.mxu0 %v5133_v7 }
0x23fb   :  { %4908 = vmatmul.mubr.msk.f32.vlgmr.msra.gmra.mrb[60].mxu0 %vm151_vm2, %v3394_v62 }
0x23fc   :  { %4916 = vmatpush3.bf16.msra.mxu0 %v5699_v48  ;;  %4917 = vmatprep.mubr.msk.bf16.mxu0 %vm5134_vm1, %v5133_v7  ;;  %v5107_v48 = vld [vmem:[%s5968_s1 + $0x10] sm:$0xff] }
0x23fd   :  { %4931 = vmatprep.subr.bf16.mxu0 %v5133_v7 }
0x24be   :  { %v3387_v10 = vpop.f32.mrb[64].mxu1 }
0x24bf   :  { %v4903_v11 = vpop.f32.mrb[65].mxu1 }
0x24c0   :  { %v3390_v12 = vpop.f32.mrb[66].mxu1 }
0x24c1   :  { %v4904_v0 = vpop.f32.mrb[67].mxu1 }
0x24c6   :  { %v3344_v43 = vpop.f32.mrb[56].mxu0 }
0x24c7   :  { %v5792_v13 = vadd.f32 %v3387_v10, %v3344_v43  ;;  %v4897_v14 = vpop.f32.mrb[57].mxu0  ;;  %v4993_v43 = vld [vmem:[%s5974_s7 + $0x10] sm:$0xff]  }
0x24c8   :  { %v3347_v9 = vpop.f32.mrb[58].mxu0  ;;  %v4996_v14 = vld [vmem:[%s5975_s8 + $0x28] sm:$0xff]  }
0x24c9   :  { %v4898_v15 = vpop.f32.mrb[59].mxu0 }
0x24ce   :  { %v3467_v16 = vpop.f32.mrb[60].mxu0 }
0x24cf   :  { %v3468_v17 = vadd.f32 %v5107_v48, %v3467_v16  ;;  %v4909_v19 = vpop.f32.mrb[61].mxu0 }
0x24d1   :  { %v3471_v20 = vadd.f32 %v3468_v17, %v5440_v24 }
0x24d3   :  { %v3472_v21 = vsel %vm151_vm2, %v3471_v20, -inf }
0x24d4   :  { %3473 = vmax.xlane.f32.xlu0 %v3472_v21 }
0x24ea   :  { %3483 = vrot.lane.b32.xlu0 %v5606_v29, %s5142_s0 }
0x24ee   :  { %3604 = vrot.lane.b32.xlu0 %v5606_v29, %s5144_s19 }
0x2561   :  { %v3474_v22 = vpop.xlane.xlu0 %3473 }
0x2562   :  { %v3475_v27 = vsub.f32 %v3471_v20, %v3474_v22 }
0x2564   :  { %v3476_v1 = vmul.f32 1.442695, %v3475_v27  ;;  %v4457_v27 = vld [vmem:[%s5973_s6 + $0x1] ss:$0 sm:$0xff] }
0x2565   :  { %v3484_v35 = vpop.permute.xlu0 %3483 }
0x2566   :  { %5089 = vpow2.f32 %v3476_v1  ;;  %4911 = vmatpush3.msra.mxu1 %v3484_v35 }
0x2567   :  { %4921 = vmatprep.subr.mxu1 %v5133_v7 }
0x2569   :  { %v3605_v41 = vpop.permute.xlu0 %3604 }
0x2570   :  { %v5090_v36 = vpop.eup %5089 }
0x2571   :  { %v3478_v37 = vsel %vm151_vm2, %v5090_v36, 0.0 }
0x2572   :  { %3479 = vadd.xlane.f32.xlu1 %v3478_v37 }
0x2583   :  { %3606 = vrot.lane.b32.xlu1 %v5606_v29, %s5987_s17 }
0x25ff   :  { %v3480_v32 = vpop.xlane.xlu1 %3479 }
0x2600   :  { %5091 = vrcp.f32 %v3480_v32  ;;  %v4997_v32 = vld [vmem:[%s5975_s8 + $0x30] sm:$0xff]  }
0x2603   :  { %v3607_v40 = vpop.permute.xlu1 %3606 }
0x260a   :  { %v5092_v50 = vpop.eup %5091 }
0x260b   :  { %v3482_v38 = vmul.f32 %v5092_v50, %v5090_v36  ;;  %v4998_v50 = vld [vmem:[%s5975_s8 + $0x38] sm:$0xff]  }
0x260d   :  { %4913 = vmatmul.mubr.msk.f32.vlgmr.msra.gmra.mrb[68].mxu1 %vm151_vm2, %v3482_v38 }
0x260e   :  { %4922 = vmatpush3.xpose.msk.msra.mxu1 %vm151_vm2, %v3607_v40  ;;  %4923 = vmatprep.mubr.msk.f32.mxu1 %vm5134_vm1, %v5133_v7 }
0x260f   :  { %4926 = vmatprep.subr.mxu1 %v5133_v7 }
0x2611   :  { %4924 = vmatmul.mubr.msk.f32.vlgmr.msra.gmra.mrb[70].mxu1 %vm151_vm2, %v3605_v41 }
0x2612   :  { %4928 = vmatprep.mubr.msk.f32.mxu1 %vm5134_vm1, %v5133_v7 }
0x26e0   :  { %v3555_v28 = vpop.f32.mrb[68].mxu1 }
0x26e1   :  { %v3559_v58 = vpack.c.bf16 %v3555_v28, %v3555_v28  ;;  %v4914_v42 = vpop.f32.mrb[69].mxu1 }
0x26e3   :  { %4918 = vmatmul.mubr.msk.bf16.vlgmr.msra.gmra.mrb[64].mxu0 %vm151_vm2, %v3559_v58 }
0x26e4   :  { %v3678_v3 = vpop.f32.mrb[70].mxu1  ;;  %4932 = vmatpush3.bf16.msra.mxu0 %v5723_v25  ;;  %4933 = vmatprep.mubr.msk.bf16.mxu0 %vm5134_vm1, %v5133_v7  ;;  %v3819_v25 = vmul.f32 %v5821_v44, %v5821_v44 }
0x26e5   :  { %v3679_v46 = vadd.f32 %v5108_v45, %v3678_v3  ;;  %v4925_v33 = vpop.f32.mrb[71].mxu1  ;;  %4945 = vmatprep.subr.bf16.mxu0 %v5133_v7 }
0x26e6   :  { %v3821_v51 = vsel %vm58_vm0, %v3819_v25, 0.0 }
0x26e7   :  { %v3682_v47 = vadd.f32 %v3679_v46, %v5440_v24 }
0x26e9   :  { %v3683_v49 = vsel %vm151_vm2, %v3682_v47, -inf }
0x26ea   :  { %3684 = vmax.xlane.f32.xlu1 %v3683_v49 }
0x26ee   :  { %3822 = vadd.xlane.f32.xlu1 %v3821_v51 }
0x2777   :  { %v3685_v61 = vpop.xlane.xlu1 %3684 }
0x2778   :  { %v3686_v39 = vsub.f32 %v3682_v47, %v3685_v61 }
0x277a   :  { %v3687_v53 = vmul.f32 1.442695, %v3686_v39 }
0x277b   :  { %v3823_v9 = vpop.xlane.xlu1 %3822 }
0x277c   :  { %5093 = vpow2.f32 %v3687_v53  ;;  %v3827_v15 = vmul.f32 0.03125, %v3823_v9  ;;  %v5146_v53 = vmov 0.0|0.0   ;;  %v5012_v9 = vld [vmem:[%s5980_s13 + $0x18] sm:$0xff]  }
0x277e   :  { %v3829_v16 = vadd.f32 1e-06, %v3827_v15  ;;  %v5013_v15 = vld [vmem:[%s5980_s13 + $0x60] sm:$0xff]  }
0x2786   :  { %v5094_v52 = vpop.eup %5093 }
0x2787   :  { %v3689_v54 = vsel %vm151_vm2, %v5094_v52, 0.0 }
0x2788   :  { %3690 = vadd.xlane.f32.xlu0 %v3689_v54 }
0x279e   :  { %3694 = vrot.lane.b32.xlu0 %v5606_v29, %s5988_s24 }
0x27b6   :  { %v3597_v24 = vpop.f32.mrb[64].mxu0 }
0x27b7   :  { %v3603_v56 = vadd.f32 %v3597_v24, %v5792_v13  ;;  %v4919_v57 = vpop.f32.mrb[65].mxu0  ;;  %v4994_v13 = vld [vmem:[%s5974_s7 + $0x18] sm:$0xff]  }
0x27b8   :  { %v3600_v59 = vpop.f32.mrb[66].mxu0 }
0x27b9   :  { %v4920_v60 = vpop.f32.mrb[67].mxu0 }
0x2815   :  { %v3691_v6 = vpop.xlane.xlu0 %3690 }
0x2816   :  { %5095 = vrcp.f32 %v3691_v6 }
0x2817   :  { %5097 = vrsqrt.f32 %v3829_v16  ;;  %v5014_v16 = vld [vmem:[%s5980_s13 + $0x20] sm:$0xff]  }
0x2819   :  { %v3695_v63 = vpop.permute.xlu0 %3694 }
0x281a   :  { %4927 = vmatpush3.msra.mxu1 %v3695_v63  ;;  %v4478_v63 = vld [vmem:[%s5976_s9] ss:$0 sm:$0xff] }
0x281b   :  { %4937 = vmatprep.subr.bf16.mxu1 %v5133_v7 }
0x2820   :  { %v5096_v4 = vpop.eup %5095 }
0x2821   :  { %v3693_v55 = vmul.f32 %v5096_v4, %v5094_v52  ;;  %v5098_v20 = vpop.eup %5097 }
0x2822   :  { %v3833_v21 = vmul.f32 %v5098_v20, %v5821_v44 }
0x2823   :  { %4929 = vmatmul.mubr.msk.f32.vlgmr.msra.gmra.mrb[72].mxu1 %vm151_vm2, %v3693_v55 }
0x2824   :  { %4941 = vmatprep.mubr.msk.bf16.mxu1 %vm5134_vm1, %v5133_v7  ;;  %4938 = vmatpush3.bf16.msra.mxu1 %v4993_v43  ;;  %v3841_v35 = vmul.f32 %v4457_v27, %v3833_v21  ;;  %v5008_v43 = vld [vmem:[%s5980_s13 + $0x8] sm:$0xff]  }
0x2825   :  { %4939 = vmatprep.subr.bf16.mxu1 %v5133_v7 }
0x2828   :  { %4940 = vmatpush3.bf16.msra.mxu1 %v4994_v13  ;;  %v5009_v13 = vld [vmem:[%s5980_s13 + $0x50] sm:$0xff]  }
0x2829   :  { %4964 = vmatprep.subr.bf16.mxu1 %v5146_v53 }
0x28f6   :  { %v3766_v29 = vpop.f32.mrb[72].mxu1 }
0x28f7   :  { %v3770_v34 = vpack.c.bf16 %v3766_v29, %v3766_v29  ;;  %v4930_v26 = vpop.f32.mrb[73].mxu1 }
0x28f9   :  { %4934 = vmatmul.mubr.msk.bf16.vlgmr.msra.gmra.mrb[68].mxu0 %vm151_vm2, %v3770_v34  ;;  %v5001_v34 = vld [vmem:[%s5978_s11 + $0x4] ss:$8 sps:$4 sm:$0xff]  }
0x28fa   :  { %4953 = vmatprep.mubr.msk.bf16.mxu0 %vm5134_vm1, %v5133_v7 }
0x29cc   :  { %v3808_v23 = vpop.f32.mrb[68].mxu0 }
0x29cd   :  { %v3814_v5 = vadd.f32 %v3808_v23, %v3603_v56  ;;  %v4935_v8 = vpop.f32.mrb[69].mxu0  ;;  %v4012_v23 = vld [vmem:[%s5977_s10] sm:$0x3] }
0x29ce   :  { %v3811_v62 = vpop.f32.mrb[70].mxu0  ;;  %v5004_v8 = vld [vmem:[%s5978_s11 + $0x14] ss:$8 sps:$4 sm:$0xff]  }
0x29cf   :  { %v3816_v10 = vadd.f32 %v3814_v5, %v5578_v2  ;;  %v4936_v11 = vpop.f32.mrb[71].mxu0  ;;  %v4995_v2 = vld [vmem:[%s5975_s8 + $0x20] sm:$0xff]   ;;  %v5002_v62 = vld [vmem:[%s5978_s11 + $0x10] ss:$8 sps:$4 sm:$0xff]  }
0x29d0   :  { %4946 = vmatpush3.bf16.msra.mxu0 %v4995_v2  ;;  %v4999_v5 = vld [vmem:[%s5978_s11] ss:$8 sps:$4 sm:$0xff]   ;;  %v5010_v2 = vld [vmem:[%s5980_s13 + $0x10] sm:$0xff]   ;;  %s5148_s11 = smov [#allocation2]  }
0x29d1   :  { %v3820_v12 = vmul.f32 %v3816_v10, %v3816_v10  ;;  %4947 = vmatprep.subr.bf16.mxu0 %v5133_v7  ;;  %v5005_v11 = vld [vmem:[%s5980_s13 + $0x40] sm:$0xff]   ;;  %s4355_s17 = sshll.u32 %s5148_s11, 4  ;;  %s4356_s17 = int_to_ptr.vmem [resolvable:$true] %s4355_s17 }
0x29d2   :  { %s5109_s7 = scalar_lea.vmem %s4356_s17, 32  ;;  %p5114_p1 = scmp.lt.s32.totalorder %s4356_s17, %s4356_s17 }
0x29d3   :  { %v3824_v0 = vsel %vm58_vm0, %v3820_v12, 0.0  ;;  %v5006_v12 = vld [vmem:[%s5980_s13] sm:$0xff]   ;;  %p5110_p0 = scmp.ne.s32.totalorder %s4356_s17, %s5109_s7  ;;  %p5115_p2 = scmp.lt.s32.totalorder %s5109_s7, %s5109_s7 }
0x29d4   :  { %3825 = vadd.xlane.f32.xlu1 %v3824_v0  ;;  %4948 = vmatpush3.bf16.msra.mxu0 %v4996_v14  ;;  %v5007_v0 = vld [vmem:[%s5980_s13 + $0x48] sm:$0xff]   ;;  %v5011_v14 = vld [vmem:[%s5980_s13 + $0x58] sm:$0xff]  }
0x29d5   :  { %4949 = vmatprep.subr.bf16.mxu0 %v5133_v7  ;;  %p5116_p3 = por %p5115_p2, %p5114_p1 }
0x29d7   :  { %p5117_p4 = pnand %p5116_p3, %p5110_p0 }
0x29d8   :  { %4950 = vmatpush3.bf16.msra.mxu0 %v4997_v32 }
0x29d9   :  { %4951 = vmatprep.subr.bf16.mxu0 %v5133_v7 }
0x29dc   :  { %4952 = vmatpush3.bf16.msra.mxu0 %v4998_v50 }
0x29dd   :  { %4623 = vmatprep.subr.bf16.mxu0 %v5005_v11 }
0x2a61   :  { %v3826_v48 = vpop.xlane.xlu1 %3825 }
0x2a62   :  { %v3828_v17 = vmul.f32 0.03125, %v3826_v48  ;;  %v5015_v48 = vld [vmem:[%s5980_s13 + $0x68] sm:$0xff]  }
0x2a64   :  { %v3830_v19 = vadd.f32 1e-06, %v3828_v17  ;;  %v5016_v17 = vld [vmem:[%s5980_s13 + $0x28] sm:$0xff]  }
0x2a66   :  { %5099 = vrsqrt.f32 %v3830_v19 }
0x2a70   :  { %v5100_v22 = vpop.eup %5099 }
0x2a71   :  { %v3834_v1 = vmul.f32 %v5100_v22, %v3816_v10  ;;  %v5017_v22 = vld [vmem:[%s5980_s13 + $0x70] sm:$0xff]  }
0x2a73   :  { %v3842_v36 = vmul.f32 %v4457_v27, %v3834_v1  ;;  %v5018_v27 = vld [vmem:[%s5980_s13 + $0x30] sm:$0xff]   ;;  %v5019_v1 = vld [vmem:[%s5980_s13 + $0x78] sm:$0xff]  }
0x2a75   :  { %v3843_v37 = vpack.c.bf16 %v3842_v36, %v3841_v35  ;;  %v5020_v35 = vld [vmem:[%s5980_s13 + $0x38] sm:$0xff]   ;;  %v4092_v36 = vld [vmem:[%s5979_s12] sm:$0x3] }
0x2a76   :  { %v4101_v32 = vrot.slane %v4092_v36, %v1092_v18 }
0x2a77   :  { %4942 = vmatmul.mubr.msk.bf16.vlgmr.msra.gmra.mrb[76].mxu1 %vm58_vm0, %v3843_v37  ;;  %v4097_v37 = vrot.slane %v4092_v36, %v228_v31  ;;  %v4485_v31 = vld [vmem:[%s5981_s14] ss:$0 sm:$0xff] }
0x2a78   :  { %4961 = vmatprep.mubr.msk.f32.mxu1 %vm5134_vm1, %v5133_v7 }
0x2b4a   :  { %v3898_v38 = vpop.f32.mrb[76].mxu1 }
0x2b4b   :  { %v4943_v40 = vpop.f32.mrb[77].mxu1  ;;  %v3905_v28 = vmax.f32 %v3898_v38, 0.0 }
0x2b4c   :  { %v3901_v41 = vpop.f32.mrb[78].mxu1 }
0x2b4d   :  { %v3906_v58 = vmax.f32 %v3901_v41, 0.0  ;;  %v4944_v42 = vpop.f32.mrb[79].mxu1 }
0x2b4f   :  { %v3907_v3 = vpack.c.bf16 %v3906_v58, %v3905_v28 }
0x2b51   :  { %4954 = vmatmul.mubr.msk.bf16.vlgmr.msra.gmra.mrb[72].mxu0 %vm1981_vm4, %v3907_v3 }
0x2b52   :  { %4624 = vmatpush3.bf16.msra.mxu0 %v5006_v12 }
0x2b53   :  { %4625 = vmatprep.subr.bf16.mxu0 %v5007_v0 }
0x2b56   :  { %4626 = vmatpush3.bf16.msra.mxu0 %v5008_v43 }
0x2b57   :  { %4627 = vmatprep.subr.bf16.mxu0 %v5009_v13 }
0x2b5a   :  { %4628 = vmatpush3.bf16.msra.mxu0 %v5010_v2 }
0x2b5b   :  { %4629 = vmatprep.subr.bf16.mxu0 %v5011_v14 }
0x2b5e   :  { %4630 = vmatpush3.bf16.msra.mxu0 %v5012_v9 }
0x2b5f   :  { %4631 = vmatprep.subr.bf16.mxu0 %v5013_v15 }
0x2b62   :  { %4632 = vmatpush3.bf16.msra.mxu0 %v5014_v16 }
0x2b63   :  { %4633 = vmatprep.subr.bf16.mxu0 %v5015_v48 }
0x2b66   :  { %4634 = vmatpush3.bf16.msra.mxu0 %v5016_v17 }
0x2b67   :  { %4635 = vmatprep.subr.bf16.mxu0 %v5017_v22 }
0x2b6a   :  { %4636 = vmatpush3.bf16.msra.mxu0 %v5018_v27 }
0x2b6b   :  { %4637 = vmatprep.subr.bf16.mxu0 %v5019_v1 }
0x2b6e   :  { %4638 = vmatpush3.bf16.msra.mxu0 %v5020_v35 }
0x2c24   :  { %v3978_v45 = vpop.f32.mrb[72].mxu0 }
0x2c25   :  { %v3985_v46 = vadd.f32 %v3978_v45, %v5821_v44  ;;  %v4955_v33 = vpop.f32.mrb[73].mxu0 }
0x2c26   :  { %v3981_v47 = vpop.f32.mrb[74].mxu0 }
0x2c27   :  { %v3986_v7 = vadd.f32 %v3981_v47, %v3816_v10  ;;  %v4956_v49 = vpop.f32.mrb[75].mxu0  ;;  %v3988_v25 = vmul.f32 %v3985_v46, %v3985_v46  ;;  %v5147_v10 = vmov 0  }
0x2c29   :  { %v3990_v51 = vsel %vm58_vm0, %v3988_v25, 0.0  ;;  %v3989_v61 = vmul.f32 %v3986_v7, %v3986_v7 }
0x2c2a   :  { %3991 = vadd.xlane.f32.xlu1 %v3990_v51 }
0x2c2b   :  { %v3993_v39 = vsel %vm58_vm0, %v3989_v61, 0.0 }
0x2c2e   :  { %3994 = vadd.xlane.f32.xlu1 %v3993_v39 }
0x2cb7   :  { %v3992_v52 = vpop.xlane.xlu1 %3991 }
0x2cb8   :  { %v3996_v54 = vmul.f32 0.03125, %v3992_v52 }
0x2cba   :  { %v3998_v24 = vadd.f32 1e-06, %v3996_v54 }
0x2cbb   :  { %v3995_v56 = vpop.xlane.xlu1 %3994 }
0x2cbc   :  { %5101 = vrsqrt.f32 %v3998_v24  ;;  %v3997_v44 = vmul.f32 0.03125, %v3995_v56 }
0x2cbe   :  { %v3999_v57 = vadd.f32 1e-06, %v3997_v44 }
0x2cc0   :  { %5103 = vrsqrt.f32 %v3999_v57 }
0x2cc6   :  { %v5102_v59 = vpop.eup %5101 }
0x2cc7   :  { %v4002_v60 = vmul.f32 %v5102_v59, %v3985_v46 }
0x2cc9   :  { %v4010_v55 = vmul.f32 %v4478_v63, %v4002_v60 }
0x2cca   :  { %v5104_v6 = vpop.eup %5103 }
0x2ccb   :  { %v4003_v4 = vmul.f32 %v5104_v6, %v3986_v7 }
0x2ccd   :  { %v4011_v29 = vmul.f32 %v4478_v63, %v4003_v4 }
0x2ccf   :  { %v4965_v26 = vpack.c.bf16 %v4011_v29, %v4010_v55 }
0x2cd1   :  { %4966 = vmatpush3.bf16.msra.mxu1 %v4965_v26 }
0x2cd2   :  { %4127 = vmatprep.subr.bf16.mxu1 %v5001_v34 }
0x2cd4   :  { %4962 = vmatmul.mubr.msk.f32.vlgmr.msra.gmra.mrb[74].mxu1 %vm4013_vm5, %v4012_v23 }
0x2cd5   :  { %4128 = vmatpush1.bf16.msra.mxu1 %v4999_v5  ;;  %4159 = vmatprep.mubr.bf16.mxu1 %v5147_v10 }
0x2cd6   :  { %4129 = vmatprep.subr.bf16.mxu1 %v5004_v8 }
0x2cd9   :  { %4130 = vmatpush1.bf16.msra.mxu1 %v5002_v62 }
0x2da7   :  { %v4083_v19 = vpop.f32.mrb[74].mxu1 }
0x2da8   :  { %v4087_v20 = vpack.c.bf16 %v4083_v19, %v4083_v19  ;;  %v4963_v21 = vpop.f32.mrb[75].mxu1 }
0x2daa   :  { %4484 = vmatmul.mubr.msk.bf16.vlgmr.msra.gmra.mrb[80].mxu1 %vm58_vm0, %v4087_v20 }
0x2e7d   :  { %v4161_v50 = vpop.f32.mrb[80].mxu1 }
0x2e7e   :  { %v4162_v38 = vadd.f32 %v4161_v50, %v4097_v37  ;;  %v4163_v40 = vpop.f32.mrb[81].mxu1 }
0x2e7f   :  { %v4164_v41 = vadd.f32 %v4163_v40, %v4101_v32  ;;  %v4165_v28 = vpop.f32.mrb[82].mxu1 }
0x2e80   :  { %v4168_v58 = vmax.f32 %v4162_v38, 0.0  ;;  %v4166_v42 = vpop.f32.mrb[83].mxu1 }
0x2e81   :  { %v4169_v3 = vmax.f32 %v4164_v41, 0.0 }
0x2e82   :  { %v4170_v46 = vpack.c.bf16 %v4168_v58, %v4168_v58 }
0x2e83   :  { %v4171_v45 = vpack.c.bf16 %v4169_v3, %v4169_v3 }
0x2e85   :  { %4339 = vmatprep.mubr.bf16.mxu0 %v4171_v45 }
0x2e86   :  { %4340 = vmatmul.mubr.bf16.vlgmr.msra.gmra.mrb[76].mxu0 %v4170_v46 }
0x2f59   :  { %v4639_v33 = vpop.f32.mrb[76].mxu0 }
0x2f5a   :  { %v4640_v47 = vpop.f32.mrb[77].mxu0 }
0x2f5b   :  { %v4641_v30 = vadd.f32 %v4640_v47, %v4639_v33  ;;  %v4642_v18 = vpop.f32.mrb[78].mxu0 }
0x2f5c   :  { %v4643_v7 = vpop.f32.mrb[79].mxu0 }
0x2f5d   :  { %v4342_v49 = vadd.f32 %v4641_v30, %v4485_v31 }
0x2f5f   :  { %4348 = vst.msk [vmem:[#allocation2] sm:$0x3] %vm4347_vm6, %v4342_v49 }
0x2f60   :  { %5120 = shalt.err (!%p5117_p4)
}
0x2f61   :  { %s5121_s14 = scalar_lea.hbm %s5982_s15, 32 }
0x2f62   :  { %p5122_p5 = scmp.ne.s32.totalorder %s5982_s15, %s5121_s14  ;;  %p5125_p6 = scmp.lt.u32.totalorder %s5121_s14, %s5982_s15 }
0x2f64   :  { %p5127_p7 = pnand %p5125_p6, %p5122_p5 }
0x2f66   :  { %5130 = shalt.err (!%p5127_p7)
}
0x2f67   :  { %4358 = dma.vmem_to_hbm [thread:$0]  %s4356_s17, 32, %s5982_s15, [#allocation3]  }
0x2f68   :  { %5131 = dma.done.wait [#allocation3], 32  }
0x2f69   :  { %5132 = vsyncadd [#allocation3], 4294967264 }
0x2f6a   :  { %4362 = vsyncpa [#allocation3], 1 }

</bundles_post_ra>
